<compile_context>
chip_gen: v7x
topology: tpu7x:2x2x1
jax: 0.10.0
libtpu: 0.0.40
codegen_flags: <defaults>
</compile_context>

<pallas_src>
import math

import jax
import jax.numpy as jnp
from jax.experimental import pallas as pl
from jax.experimental.pallas import tpu as pltpu


# ---------------------------------------------------------------------------
# small helpers
# ---------------------------------------------------------------------------

def _dense_group(m, c):
    """Group g rows so the fused last dim g*c is a multiple of 128 lanes."""
    g = 128 // math.gcd(128, c)
    return g if (m % g == 0) else 1


def _row_tile(m, d):
    """Row tile for an (m, d) f32 elementwise pass; zero-pad fallback if no divisor."""
    cap = max(8, min(512, (2 * 1024 * 1024) // max(4 * d, 1)))
    for t in (512, 256, 128, 64, 32, 16, 8):
        if t <= cap and m % t == 0:
            return t, 0
    return 8, (-m) % 8


def _depth_to_space2(x):
    """(N, H, W, 4, C) phase layout (phase = r*2+c) -> (N, 2H, 2W, C)."""
    n, h, w, _, c = x.shape
    x = x.reshape(n, h, w, 2, 2, c)
    x = jnp.transpose(x, (0, 1, 3, 2, 4, 5))
    return x.reshape(n, 2 * h, 2 * w, c)


def _bn_scale_shift(s, sq, count, gamma, beta, eps=1e-5):
    mean = s / count
    var = jnp.maximum(sq / count - mean * mean, 0.0)   # clamp against cancellation
    scale = gamma * jax.lax.rsqrt(var + eps)
    shift = beta - mean * scale
    return scale, shift


# ---------------------------------------------------------------------------
# Pallas kernel 1: direct conv with in-kernel tap reduction + fused BN stats
# ---------------------------------------------------------------------------

def _make_conv_rows_kernel(kh, kw, wo):
    def kernel(*refs):
        rows = refs[:kh]
        w_ref, b_ref = refs[kh], refs[kh + 1]
        o_ref, sum_ref, sq_ref = refs[kh + 2], refs[kh + 3], refs[kh + 4]
        co = w_ref.shape[2]
        acc = jnp.zeros((wo, co), jnp.float32)
        for dy in range(kh):
            row = rows[dy][0, 0]                         # (Wp, Cin) bf16, VMEM
            for dx in range(kw):
                win = row[dx:dx + wo, :]                 # shifted window, no HBM im2col
                acc = acc + jnp.dot(win, w_ref[dy * kw + dx],
                                    preferred_element_type=jnp.float32)
        y = acc + b_ref[...]                             # (wo, co) + (1, co)
        o_ref[0, 0] = y
        # fused BatchNorm statistics (per-row partials, reduced outside the kernel)
        sum_ref[0, 0] = jnp.sum(y, axis=0, keepdims=True)
        sq_ref[0, 0] = jnp.sum(y * y, axis=0, keepdims=True)
    return kernel


def conv_rows(xp, w_taps, bias_row, kh, kw):
    """out[n,i,j,:] = sum_{dy,dx} xp[n,i+dy,j+dx,:] @ w_taps[dy*kw+dx] + bias.

    xp:       (N, Ho+kh-1, Wo+kw-1, Cin) bf16, already padded as needed.
    w_taps:   (kh*kw, Cin, Co)           bf16.
    bias_row: (1, Co)                    f32.
    Returns the conv output (N, Ho, Wo, Co) f32 plus per-row partial sum / sum-of-squares
    (N, Ho, 1, Co) for the fused BatchNorm statistics.
    """
    n, hp, wp, cin = xp.shape
    t, cin2, co = w_taps.shape
    assert t == kh * kw and cin2 == cin
    ho, wo = hp - kh + 1, wp - kw + 1

    row_specs = [
        pl.BlockSpec((1, 1, wp, cin), (lambda nn, ii, dy=dy: (nn, ii + dy, 0, 0)))
        for dy in range(kh)
    ]
    y, s, sq = pl.pallas_call(
        _make_conv_rows_kernel(kh, kw, wo),
        out_shape=(jax.ShapeDtypeStruct((n, ho, wo, co), jnp.float32),
                   jax.ShapeDtypeStruct((n, ho, 1, co), jnp.float32),
                   jax.ShapeDtypeStruct((n, ho, 1, co), jnp.float32)),
        grid=(n, ho),
        in_specs=row_specs + [
            pl.BlockSpec((t, cin, co), lambda nn, ii: (0, 0, 0)),   # resident weights
            pl.BlockSpec((1, co), lambda nn, ii: (0, 0)),
        ],
        out_specs=(pl.BlockSpec((1, 1, wo, co), lambda nn, ii: (nn, ii, 0, 0)),
                   pl.BlockSpec((1, 1, 1, co), lambda nn, ii: (nn, ii, 0, 0)),
                   pl.BlockSpec((1, 1, 1, co), lambda nn, ii: (nn, ii, 0, 0))),
        compiler_params=pltpu.CompilerParams(
            dimension_semantics=("parallel", "parallel"),
            vmem_limit_bytes=32 * 1024 * 1024),
    )(*([xp] * kh + [w_taps, bias_row]))
    return y, s, sq


# ---------------------------------------------------------------------------
# Pallas kernels 2/3: fused, lane-dense elementwise stages
# ---------------------------------------------------------------------------

def _bn_prelu_kernel(x_ref, s_ref, t_ref, a_ref, o_ref):
    y = x_ref[...] * s_ref[...] + t_ref[...]
    o_ref[...] = jnp.where(y >= 0.0, y, a_ref[...] * y)


def _bn_add_prelu_kernel(c2_ref, us_ref, s2_ref, t2_ref, a2_ref,
                         su_ref, tu_ref, ao_ref, o_ref):
    y2 = c2_ref[...] * s2_ref[...] + t2_ref[...]        # BN(conv2)
    y2 = jnp.where(y2 >= 0.0, y2, a2_ref[...] * y2)     # PReLU2
    ys = us_ref[...] * su_ref[...] + tu_ref[...]        # BN(skip)
    z = y2 + ys                                         # residual add
    o_ref[...] = jnp.where(z >= 0.0, z, ao_ref[...] * z)  # output PReLU


def _elementwise_call(kernel, tensors, rows):
    m, d = tensors[0].shape
    tm, pad = _row_tile(m, d)
    if pad:
        tensors = [jnp.pad(x, ((0, pad), (0, 0))) for x in tensors]
    mp = m + pad
    out = pl.pallas_call(
        kernel,
        out_shape=jax.ShapeDtypeStruct((mp, d), jnp.float32),
        grid=(mp // tm,),
        in_specs=([pl.BlockSpec((tm, d), lambda i: (i, 0)) for _ in tensors]
                  + [pl.BlockSpec((1, d), lambda i: (0, 0)) for _ in rows]),
        out_specs=pl.BlockSpec((tm, d), lambda i: (i, 0)),
        compiler_params=pltpu.CompilerParams(
            dimension_semantics=("parallel",),
            vmem_limit_bytes=32 * 1024 * 1024),
    )(*tensors, *rows)
    return out[:m] if pad else out


def _dense(x2d, g):
    m, c = x2d.shape
    return x2d.reshape(m // g, g * c)


def _dense_row(vec, g, c):
    return jnp.tile(vec.astype(jnp.float32), g).reshape(1, g * c)


def bn_prelu(x2d, scale, shift, alpha):
    """PReLU(x * scale + shift) over an (M, C) activation, lane-dense layout."""
    m, c = x2d.shape
    g = _dense_group(m, c)
    d = g * c
    out = _elementwise_call(
        _bn_prelu_kernel,
        [_dense(x2d, g)],
        [_dense_row(scale, g, c), _dense_row(shift, g, c),
         jnp.full((1, d), alpha, jnp.float32)])
    return out.reshape(m, c)


def bn_add_prelu(c2, us, sc2, sh2, a2, scu, shu, aout):
    """PReLU_out( PReLU2(BN2(c2)) + BN_us(us) ), one fused pass."""
    m, c = c2.shape
    g = _dense_group(m, c)
    d = g * c
    out = _elementwise_call(
        _bn_add_prelu_kernel,
        [_dense(c2, g), _dense(us, g)],
        [_dense_row(sc2, g, c), _dense_row(sh2, g, c),
         jnp.full((1, d), a2, jnp.float32),
         _dense_row(scu, g, c), _dense_row(shu, g, c),
         jnp.full((1, d), aout, jnp.float32)])
    return out.reshape(m, c)


# ---------------------------------------------------------------------------
# one-time weight preprocessing (hoisted out of the forward path)
# ---------------------------------------------------------------------------

def _flip_transpose(w_t):
    # PyTorch ConvTranspose2d weight (Cin, Cout, K, K) -> direct-conv (K, K, Cin, Cout)
    return jnp.transpose(w_t[:, :, ::-1, ::-1], (2, 3, 0, 1))


_SUBPIX_SEL = {(0, 0): 1, (1, 0): 0, (1, 1): 2}   # (phase parity, tap dy/dx) -> 3x3 index


def prepare_params(p):
    cin, cout = p["c1_w"].shape[0], p["c1_w"].shape[1]

    # conv1 (3x3, stride 2) -> sub-pixel 2x2 conv with 4*cout output columns.
    wf1 = _flip_transpose(p["c1_w"].astype(jnp.float32))            # (3, 3, cin, cout)
    taps = []
    for dy in range(2):
        for dx in range(2):
            cols = []
            for r in range(2):
                for c in range(2):
                    if (r, dy) in _SUBPIX_SEL and (c, dx) in _SUBPIX_SEL:
                        cols.append(wf1[_SUBPIX_SEL[(r, dy)], _SUBPIX_SEL[(c, dx)]])
                    else:
                        cols.append(jnp.zeros((cin, cout), jnp.float32))
            taps.append(jnp.concatenate(cols, axis=1))               # (cin, 4*cout)
    w1_taps = jnp.stack(taps, axis=0).astype(jnp.bfloat16)           # (4, cin, 4*cout)
    b1_row = jnp.tile(p["c1_b"].astype(jnp.float32), 4).reshape(1, 4 * cout)

    # us (1x1, stride 2): only the (even, even) sub-pixel phase is a real conv.
    wus_taps = p["us_w"][:, :, 0, 0].astype(jnp.bfloat16).reshape(1, cin, cout)
    bus_row = p["us_b"].astype(jnp.float32).reshape(1, cout)

    # conv2 (3x3, stride 1).
    w2_taps = _flip_transpose(p["c2_w"].astype(jnp.float32)).reshape(
        9, cout, cout).astype(jnp.bfloat16)
    b2_row = p["c2_b"].astype(jnp.float32).reshape(1, cout)

    kp = {"w1_taps": w1_taps, "b1_row": b1_row,
          "wus_taps": wus_taps, "bus_row": bus_row,
          "w2_taps": w2_taps, "b2_row": b2_row}
    for k in ("c1_gamma", "c1_beta", "c2_gamma", "c2_beta", "us_gamma", "us_beta",
              "c1_alpha", "c2_alpha", "out_alpha"):
        kp[k] = jnp.asarray(p[k], jnp.float32)
    return kp


# ---------------------------------------------------------------------------
# forward pass
# ---------------------------------------------------------------------------

def deconv_res_block(x_nchw, kp):
    n, _, h, w = x_nchw.shape
    cout = kp["b2_row"].shape[1]

    x = jnp.transpose(x_nchw, (0, 2, 3, 1)).astype(jnp.bfloat16)    # NHWC bf16

    # conv1: sub-pixel 2x2 conv (no zero-insertion), fused bias + BN stats.
    xp1 = jnp.pad(x, ((0, 0), (0, 1), (0, 1), (0, 0)))
    y1, s1p, q1p = conv_rows(xp1, kp["w1_taps"], kp["b1_row"], 2, 2)  # (N,H,W,4*cout)

    # us: 1x1 conv gives the (even, even) phase; the other phases are bias only.
    yu, sup, qup = conv_rows(x, kp["wus_taps"], kp["bus_row"], 1, 1)  # (N,H,W,cout)

    count = float(4 * n * h * w)            # elements per channel of each BN input

    s1 = jnp.sum(s1p, axis=(0, 1, 2)).reshape(4, cout).sum(axis=0)
    q1 = jnp.sum(q1p, axis=(0, 1, 2)).reshape(4, cout).sum(axis=0)
    sc1, sh1 = _bn_scale_shift(s1, q1, count, kp["c1_gamma"], kp["c1_beta"])

    b_us = kp["bus_row"][0]
    n_rest = float(3 * n * h * w)           # bias-only output positions of the us deconv
    su_ = jnp.sum(sup, axis=(0, 1, 2)) + n_rest * b_us
    qu_ = jnp.sum(qup, axis=(0, 1, 2)) + n_rest * b_us * b_us
    scu, shu = _bn_scale_shift(su_, qu_, count, kp["us_gamma"], kp["us_beta"])

    # BN1 + PReLU1 (fused, lane-dense, on the phase layout), then depth-to-space.
    h1_flat = bn_prelu(y1.reshape(n * h * w, 4 * cout),
                       jnp.tile(sc1, 4), jnp.tile(sh1, 4), kp["c1_alpha"])
    h1 = _depth_to_space2(h1_flat.reshape(n, h, w, 4, cout))          # (N,2H,2W,cout)

    # conv2: 3x3 stride-1, fused bias + BN stats.
    xp2 = jnp.pad(h1.astype(jnp.bfloat16), ((0, 0), (1, 1), (1, 1), (0, 0)))
    y2, s2p, q2p = conv_rows(xp2, kp["w2_taps"], kp["b2_row"], 3, 3)   # (N,2H,2W,cout)
    sc2, sh2 = _bn_scale_shift(jnp.sum(s2p, axis=(0, 1, 2)),
                               jnp.sum(q2p, axis=(0, 1, 2)),
                               count, kp["c2_gamma"], kp["c2_beta"])

    # Skip branch at full resolution: phase (0,0) = conv output, other phases = bias.
    bias_plane = jnp.broadcast_to(kp["bus_row"].reshape(1, 1, 1, cout), (n, h, w, cout))
    us_full = _depth_to_space2(
        jnp.stack([yu, bias_plane, bias_plane, bias_plane], axis=3))   # (N,2H,2W,cout)

    # BN2 + PReLU2 + BN_us + residual add + output PReLU, single fused pass.
    out_flat = bn_add_prelu(y2.reshape(4 * n * h * w, cout),
                            us_full.reshape(4 * n * h * w, cout),
                            sc2, sh2, kp["c2_alpha"], scu, shu, kp["out_alpha"])
    out = out_flat.reshape(n, 2 * h, 2 * w, cout)
    return jnp.transpose(out, (0, 3, 1, 2))                           # NCHW


# ---------------------------------------------------------------------------
# plain-JAX reference (same bf16 matmul inputs) for a correctness check
# ---------------------------------------------------------------------------

def _conv_transpose_ref(x_nhwc, w_t, b, stride, pad, out_pad):
    n, h, w, cin = x_nhwc.shape
    _, cout, k, _ = w_t.shape
    if stride > 1:
        up = jnp.zeros((n, (h - 1) * stride + 1, (w - 1) * stride + 1, cin),
                       x_nhwc.dtype)
        up = up.at[:, ::stride, ::stride, :].set(x_nhwc)
    else:
        up = x_nhwc
    lo = k - 1 - pad
    hi = k - 1 - pad + out_pad
    xp = jnp.pad(up, ((0, 0), (lo, hi), (lo, hi), (0, 0)))
    wc = jnp.transpose(w_t[:, :, ::-1, ::-1], (2, 3, 0, 1)).astype(x_nhwc.dtype)
    y = jax.lax.conv_general_dilated(
        xp, wc, window_strides=(1, 1), padding="VALID",
        dimension_numbers=("NHWC", "HWIO", "NHWC"),
        preferred_element_type=jnp.float32)
    return y + b.reshape(1, 1, 1, cout).astype(jnp.float32)


def _bn_ref(y, gamma, beta, eps=1e-5):
    mean = jnp.mean(y, axis=(0, 1, 2))
    var = jnp.mean(jnp.square(y - mean), axis=(0, 1, 2))
    return (y - mean) * jax.lax.rsqrt(var + eps) * gamma + beta


def _prelu_ref(y, a):
    return jnp.where(y >= 0.0, y, a * y)


def deconv_res_block_ref(x_nchw, p):
    x = jnp.transpose(x_nchw, (0, 2, 3, 1)).astype(jnp.bfloat16)
    skip = _bn_ref(_conv_transpose_ref(x, p["us_w"], p["us_b"], 2, 0, 1),
                   p["us_gamma"], p["us_beta"])
    h1 = _prelu_ref(_bn_ref(_conv_transpose_ref(x, p["c1_w"], p["c1_b"], 2, 1, 1),
                            p["c1_gamma"], p["c1_beta"]), p["c1_alpha"])
    h2 = _prelu_ref(_bn_ref(_conv_transpose_ref(h1.astype(jnp.bfloat16),
                                                p["c2_w"], p["c2_b"], 1, 1, 0),
                            p["c2_gamma"], p["c2_beta"]), p["c2_alpha"])
    out = _prelu_ref(h2 + skip, p["out_alpha"])
    return jnp.transpose(out, (0, 3, 1, 2))


# ---------------------------------------------------------------------------
# parameter init (PyTorch-layout weights) and driver
# ---------------------------------------------------------------------------

def init_params(key, in_channels, out_channels):
    ks = jax.random.split(key, 8)
    return {
        "c1_w": 0.1 * jax.random.normal(ks[0], (in_channels, out_channels, 3, 3), jnp.float32),
        "c1_b": 0.1 * jax.random.normal(ks[1], (out_channels,), jnp.float32),
        "c2_w": 0.1 * jax.random.normal(ks[2], (out_channels, out_channels, 3, 3), jnp.float32),
        "c2_b": 0.1 * jax.random.normal(ks[3], (out_channels,), jnp.float32),
        "us_w": 0.1 * jax.random.normal(ks[4], (in_channels, out_channels, 1, 1), jnp.float32),
        "us_b": 0.1 * jax.random.normal(ks[5], (out_channels,), jnp.float32),
        "c1_gamma": 1.0 + 0.1 * jax.random.normal(ks[6], (out_channels,), jnp.float32),
        "c1_beta": 0.1 * jax.random.normal(ks[7], (out_channels,), jnp.float32),
        "c2_gamma": jnp.ones((out_channels,), jnp.float32),
        "c2_beta": jnp.zeros((out_channels,), jnp.float32),
        "us_gamma": jnp.ones((out_channels,), jnp.float32),
        "us_beta": jnp.zeros((out_channels,), jnp.float32),
        "c1_alpha": jnp.float32(0.25),
        "c2_alpha": jnp.float32(0.25),
        "out_alpha": jnp.float32(0.25),
    }


if __name__ == "__main__":
    key = jax.random.PRNGKey(0)
    k_x, k_p = jax.random.split(key)

    N, C_IN, C_OUT, H, W = 2, 4, 8, 16, 16
    x = jax.random.normal(k_x, (N, C_IN, H, W), jnp.float32)
    params = init_params(k_p, C_IN, C_OUT)
    kparams = prepare_params(params)          # one-time weight layout / bf16 packing

    fwd = jax.jit(deconv_res_block)
    out = jax.block_until_ready(fwd(x, kparams))

    assert out.shape == (N, C_OUT, 2 * H, 2 * W), out.shape
    assert bool(jnp.all(jnp.isfinite(out)))

    ref = jax.block_until_ready(jax.jit(deconv_res_block_ref)(x, params))
    err = float(jnp.max(jnp.abs(out - ref)))
    assert err < 2e-2, f"max abs error vs reference: {err}"

    print("KERNEL_OK")
</pallas_src>

<mosaic_0001>
module attributes {stable_mosaic.version = 11 : i64} {
  func.func @kernel(%arg0: i32, %arg1: i32, %arg2: memref<1x1x17x4xbf16, #tpu.memory_space<vmem>>, %arg3: memref<1x1x17x4xbf16, #tpu.memory_space<vmem>>, %arg4: memref<4x4x32xbf16, #tpu.memory_space<vmem>>, %arg5: memref<1x32xf32, #tpu.memory_space<vmem>>, %arg6: memref<1x1x16x32xf32, #tpu.memory_space<vmem>>, %arg7: memref<1x1x1x32xf32, #tpu.memory_space<vmem>>, %arg8: memref<1x1x1x32xf32, #tpu.memory_space<vmem>>) attributes {dimension_semantics = [#tpu.dimension_semantics<parallel>, #tpu.dimension_semantics<parallel>], iteration_bounds = array<i64: 2, 16>, scalar_prefetch = 0 : i64, scratch_operands = 0 : i64, tpu.core_type = #tpu.core_type<tc>, window_params = [{transform_indices = @transform_0, window_bounds = array<i64: 1, 1, 17, 4>}, {transform_indices = @transform_1, window_bounds = array<i64: 1, 1, 17, 4>}, {pipeline_mode = #tpu.pipeline_mode<synchronous>, transform_indices = @transform_2, window_bounds = array<i64: 4, 4, 32>}, {pipeline_mode = #tpu.pipeline_mode<synchronous>, transform_indices = @transform_3, window_bounds = array<i64: 1, 32>}, {transform_indices = @transform_4, window_bounds = array<i64: 1, 1, 16, 32>}, {transform_indices = @transform_5, window_bounds = array<i64: 1, 1, 1, 32>}, {transform_indices = @transform_6, window_bounds = array<i64: 1, 1, 1, 32>}]} {
    %cst = arith.constant 0.000000e+00 : f32
    %0 = vector.broadcast %cst : f32 to vector<16x32xf32>
    %c0 = arith.constant 0 : index
    %c0_0 = arith.constant 0 : index
    %c0_1 = arith.constant 0 : index
    %c0_2 = arith.constant 0 : index
    %1 = vector.load %arg2[%c0, %c0_0, %c0_1, %c0_2] : memref<1x1x17x4xbf16, #tpu.memory_space<vmem>>, vector<1x1x17x4xbf16>
    %2 = vector.shape_cast %1 : vector<1x1x17x4xbf16> to vector<17x4xbf16>
    %3 = vector.extract_strided_slice %2 {offsets = [0, 0], sizes = [16, 4], strides = [1, 1]} : vector<17x4xbf16> to vector<16x4xbf16>
    %c0_3 = arith.constant 0 : index
    %c0_4 = arith.constant 0 : index
    %c0_5 = arith.constant 0 : index
    %4 = vector.load %arg4[%c0_3, %c0_4, %c0_5] : memref<4x4x32xbf16, #tpu.memory_space<vmem>>, vector<1x4x32xbf16>
    %5 = vector.shape_cast %4 : vector<1x4x32xbf16> to vector<4x32xbf16>
    %cst_6 = arith.constant dense<0.000000e+00> : vector<16x32xf32>
    %6 = tpu.matmul %3, %5, %cst_6 {dimension_numbers = #tpu.dot_dimension_numbers<[1], [0], [0], [1], [0, 0, 1, 1], [], []>} : vector<16x4xbf16>, vector<4x32xbf16>, vector<16x32xf32> -> vector<16x32xf32>
    %7 = arith.addf %0, %6 : vector<16x32xf32>
    %8 = vector.extract_strided_slice %2 {offsets = [1, 0], sizes = [16, 4], strides = [1, 1]} : vector<17x4xbf16> to vector<16x4xbf16>
    %c1 = arith.constant 1 : index
    %c0_7 = arith.constant 0 : index
    %c0_8 = arith.constant 0 : index
    %9 = vector.load %arg4[%c1, %c0_7, %c0_8] : memref<4x4x32xbf16, #tpu.memory_space<vmem>>, vector<1x4x32xbf16>
    %10 = vector.shape_cast %9 : vector<1x4x32xbf16> to vector<4x32xbf16>
    %cst_9 = arith.constant dense<0.000000e+00> : vector<16x32xf32>
    %11 = tpu.matmul %8, %10, %cst_9 {dimension_numbers = #tpu.dot_dimension_numbers<[1], [0], [0], [1], [0, 0, 1, 1], [], []>} : vector<16x4xbf16>, vector<4x32xbf16>, vector<16x32xf32> -> vector<16x32xf32>
    %12 = arith.addf %7, %11 : vector<16x32xf32>
    %c0_10 = arith.constant 0 : index
    %c0_11 = arith.constant 0 : index
    %c0_12 = arith.constant 0 : index
    %c0_13 = arith.constant 0 : index
    %13 = vector.load %arg3[%c0_10, %c0_11, %c0_12, %c0_13] : memref<1x1x17x4xbf16, #tpu.memory_space<vmem>>, vector<1x1x17x4xbf16>
    %14 = vector.shape_cast %13 : vector<1x1x17x4xbf16> to vector<17x4xbf16>
    %15 = vector.extract_strided_slice %14 {offsets = [0, 0], sizes = [16, 4], strides = [1, 1]} : vector<17x4xbf16> to vector<16x4xbf16>
    %c2 = arith.constant 2 : index
    %c0_14 = arith.constant 0 : index
    %c0_15 = arith.constant 0 : index
    %16 = vector.load %arg4[%c2, %c0_14, %c0_15] : memref<4x4x32xbf16, #tpu.memory_space<vmem>>, vector<1x4x32xbf16>
    %17 = vector.shape_cast %16 : vector<1x4x32xbf16> to vector<4x32xbf16>
    %cst_16 = arith.constant dense<0.000000e+00> : vector<16x32xf32>
    %18 = tpu.matmul %15, %17, %cst_16 {dimension_numbers = #tpu.dot_dimension_numbers<[1], [0], [0], [1], [0, 0, 1, 1], [], []>} : vector<16x4xbf16>, vector<4x32xbf16>, vector<16x32xf32> -> vector<16x32xf32>
    %19 = arith.addf %12, %18 : vector<16x32xf32>
    %20 = vector.extract_strided_slice %14 {offsets = [1, 0], sizes = [16, 4], strides = [1, 1]} : vector<17x4xbf16> to vector<16x4xbf16>
    %c3 = arith.constant 3 : index
    %c0_17 = arith.constant 0 : index
    %c0_18 = arith.constant 0 : index
    %21 = vector.load %arg4[%c3, %c0_17, %c0_18] : memref<4x4x32xbf16, #tpu.memory_space<vmem>>, vector<1x4x32xbf16>
    %22 = vector.shape_cast %21 : vector<1x4x32xbf16> to vector<4x32xbf16>
    %cst_19 = arith.constant dense<0.000000e+00> : vector<16x32xf32>
    %23 = tpu.matmul %20, %22, %cst_19 {dimension_numbers = #tpu.dot_dimension_numbers<[1], [0], [0], [1], [0, 0, 1, 1], [], []>} : vector<16x4xbf16>, vector<4x32xbf16>, vector<16x32xf32> -> vector<16x32xf32>
    %24 = arith.addf %19, %23 : vector<16x32xf32>
    %c0_20 = arith.constant 0 : index
    %c0_21 = arith.constant 0 : index
    %25 = vector.load %arg5[%c0_20, %c0_21] : memref<1x32xf32, #tpu.memory_space<vmem>>, vector<1x32xf32>
    %26 = vector.broadcast %25 : vector<1x32xf32> to vector<16x32xf32>
    %27 = arith.addf %24, %26 : vector<16x32xf32>
    %c0_22 = arith.constant 0 : index
    %c0_23 = arith.constant 0 : index
    %c0_24 = arith.constant 0 : index
    %c0_25 = arith.constant 0 : index
    %28 = vector.load %arg6[%c0_22, %c0_23, %c0_24, %c0_25] : memref<1x1x16x32xf32, #tpu.memory_space<vmem>>, vector<1x1x16x32xf32>
    %29 = vector.shape_cast %28 : vector<1x1x16x32xf32> to vector<16x32xf32>
    %30 = vector.shape_cast %27 : vector<16x32xf32> to vector<1x1x16x32xf32>
    tpu.vector_store %arg6[%c0_22, %c0_23, %c0_24, %c0_25], %30 {strides = array<i32>} : memref<1x1x16x32xf32, #tpu.memory_space<vmem>>, vector<1x1x16x32xf32>,
    %cst_26 = arith.constant dense<0.000000e+00> : vector<32xf32>
    %31 = vector.multi_reduction <add>, %27, %cst_26 [0] : vector<16x32xf32> to vector<32xf32>
    %32 = vector.shape_cast %31 : vector<32xf32> to vector<1x32xf32>
    %c0_27 = arith.constant 0 : index
    %c0_28 = arith.constant 0 : index
    %c0_29 = arith.constant 0 : index
    %c0_30 = arith.constant 0 : index
    %33 = vector.load %arg7[%c0_27, %c0_28, %c0_29, %c0_30] : memref<1x1x1x32xf32, #tpu.memory_space<vmem>>, vector<1x1x1x32xf32>
    %34 = vector.shape_cast %33 : vector<1x1x1x32xf32> to vector<1x32xf32>
    %35 = vector.shape_cast %32 : vector<1x32xf32> to vector<1x1x1x32xf32>
    tpu.vector_store %arg7[%c0_27, %c0_28, %c0_29, %c0_30], %35 {strides = array<i32>} : memref<1x1x1x32xf32, #tpu.memory_space<vmem>>, vector<1x1x1x32xf32>,
    %36 = arith.mulf %27, %27 : vector<16x32xf32>
    %cst_31 = arith.constant dense<0.000000e+00> : vector<32xf32>
    %37 = vector.multi_reduction <add>, %36, %cst_31 [0] : vector<16x32xf32> to vector<32xf32>
    %38 = vector.shape_cast %37 : vector<32xf32> to vector<1x32xf32>
    %c0_32 = arith.constant 0 : index
    %c0_33 = arith.constant 0 : index
    %c0_34 = arith.constant 0 : index
    %c0_35 = arith.constant 0 : index
    %39 = vector.load %arg8[%c0_32, %c0_33, %c0_34, %c0_35] : memref<1x1x1x32xf32, #tpu.memory_space<vmem>>, vector<1x1x1x32xf32>
    %40 = vector.shape_cast %39 : vector<1x1x1x32xf32> to vector<1x32xf32>
    %41 = vector.shape_cast %38 : vector<1x32xf32> to vector<1x1x1x32xf32>
    tpu.vector_store %arg8[%c0_32, %c0_33, %c0_34, %c0_35], %41 {strides = array<i32>} : memref<1x1x1x32xf32, #tpu.memory_space<vmem>>, vector<1x1x1x32xf32>,
    return
  }
  func.func @transform_0(%arg0: i32, %arg1: i32) -> (i32, i32, i32, i32) {
    %c0_i32 = arith.constant 0 : i32
    %0 = arith.addi %arg1, %c0_i32 : i32
    %c0_i32_0 = arith.constant 0 : i32
    %c0_i32_1 = arith.constant 0 : i32
    %c0_i32_2 = arith.constant 0 : i32
    return %arg0, %0, %c0_i32_0, %c0_i32_1 : i32, i32, i32, i32
  }
  func.func @transform_1(%arg0: i32, %arg1: i32) -> (i32, i32, i32, i32) {
    %c1_i32 = arith.constant 1 : i32
    %0 = arith.addi %arg1, %c1_i32 : i32
    %c0_i32 = arith.constant 0 : i32
    %c0_i32_0 = arith.constant 0 : i32
    %c0_i32_1 = arith.constant 0 : i32
    return %arg0, %0, %c0_i32, %c0_i32_0 : i32, i32, i32, i32
  }
  func.func @transform_2(%arg0: i32, %arg1: i32) -> (i32, i32, i32) {
    %c0_i32 = arith.constant 0 : i32
    %c0_i32_0 = arith.constant 0 : i32
    %c0_i32_1 = arith.constant 0 : i32
    %c0_i32_2 = arith.constant 0 : i32
    return %c0_i32, %c0_i32_0, %c0_i32_1 : i32, i32, i32
  }
  func.func @transform_3(%arg0: i32, %arg1: i32) -> (i32, i32) {
    %c0_i32 = arith.constant 0 : i32
    %c0_i32_0 = arith.constant 0 : i32
    %c0_i32_1 = arith.constant 0 : i32
    return %c0_i32, %c0_i32_0 : i32, i32
  }
  func.func @transform_4(%arg0: i32, %arg1: i32) -> (i32, i32, i32, i32) {
    %c0_i32 = arith.constant 0 : i32
    %c0_i32_0 = arith.constant 0 : i32
    %c0_i32_1 = arith.constant 0 : i32
    return %arg0, %arg1, %c0_i32, %c0_i32_0 : i32, i32, i32, i32
  }
  func.func @transform_5(%arg0: i32, %arg1: i32) -> (i32, i32, i32, i32) {
    %c0_i32 = arith.constant 0 : i32
    %c0_i32_0 = arith.constant 0 : i32
    %c0_i32_1 = arith.constant 0 : i32
    return %arg0, %arg1, %c0_i32, %c0_i32_0 : i32, i32, i32, i32
  }
  func.func @transform_6(%arg0: i32, %arg1: i32) -> (i32, i32, i32, i32) {
    %c0_i32 = arith.constant 0 : i32
    %c0_i32_0 = arith.constant 0 : i32
    %c0_i32_1 = arith.constant 0 : i32
    return %arg0, %arg1, %c0_i32, %c0_i32_0 : i32, i32, i32, i32
  }
}

module attributes {stable_mosaic.version = 11 : i64} {
  func.func @_bn_prelu_kernel(%arg0: i32, %arg1: memref<128x128xf32, #tpu.memory_space<vmem>>, %arg2: memref<1x128xf32, #tpu.memory_space<vmem>>, %arg3: memref<1x128xf32, #tpu.memory_space<vmem>>, %arg4: memref<1x128xf32, #tpu.memory_space<vmem>>, %arg5: memref<128x128xf32, #tpu.memory_space<vmem>>) attributes {dimension_semantics = [#tpu.dimension_semantics<parallel>], iteration_bounds = array<i64: 1>, scalar_prefetch = 0 : i64, scratch_operands = 0 : i64, tpu.core_type = #tpu.core_type<tc>, window_params = [{transform_indices = @transform_0, window_bounds = array<i64: 128, 128>}, {pipeline_mode = #tpu.pipeline_mode<synchronous>, transform_indices = @transform_1, window_bounds = array<i64: 1, 128>}, {pipeline_mode = #tpu.pipeline_mode<synchronous>, transform_indices = @transform_2, window_bounds = array<i64: 1, 128>}, {pipeline_mode = #tpu.pipeline_mode<synchronous>, transform_indices = @transform_3, window_bounds = array<i64: 1, 128>}, {transform_indices = @transform_4, window_bounds = array<i64: 128, 128>}]} {
    %c0 = arith.constant 0 : index
    %c0_0 = arith.constant 0 : index
    %0 = vector.load %arg1[%c0, %c0_0] : memref<128x128xf32, #tpu.memory_space<vmem>>, vector<128x128xf32>
    %c0_1 = arith.constant 0 : index
    %c0_2 = arith.constant 0 : index
    %1 = vector.load %arg2[%c0_1, %c0_2] : memref<1x128xf32, #tpu.memory_space<vmem>>, vector<1x128xf32>
    %2 = vector.broadcast %1 : vector<1x128xf32> to vector<128x128xf32>
    %3 = arith.mulf %0, %2 : vector<128x128xf32>
    %c0_3 = arith.constant 0 : index
    %c0_4 = arith.constant 0 : index
    %4 = vector.load %arg3[%c0_3, %c0_4] : memref<1x128xf32, #tpu.memory_space<vmem>>, vector<1x128xf32>
    %5 = vector.broadcast %4 : vector<1x128xf32> to vector<128x128xf32>
    %6 = arith.addf %3, %5 : vector<128x128xf32>
    %cst = arith.constant 0.000000e+00 : f32
    %7 = vector.broadcast %cst : f32 to vector<128x128xf32>
    %8 = arith.cmpf oge, %6, %7 : vector<128x128xf32>
    %c0_5 = arith.constant 0 : index
    %c0_6 = arith.constant 0 : index
    %9 = vector.load %arg4[%c0_5, %c0_6] : memref<1x128xf32, #tpu.memory_space<vmem>>, vector<1x128xf32>
    %10 = vector.broadcast %9 : vector<1x128xf32> to vector<128x128xf32>
    %11 = arith.mulf %10, %6 : vector<128x128xf32>
    %12 = arith.select %8, %6, %11 : vector<128x128xi1>, vector<128x128xf32>
    %c0_7 = arith.constant 0 : index
    %c0_8 = arith.constant 0 : index
    %13 = vector.load %arg5[%c0_7, %c0_8] : memref<128x128xf32, #tpu.memory_space<vmem>>, vector<128x128xf32>
    tpu.vector_store %arg5[%c0_7, %c0_8], %12 {strides = array<i32>} : memref<128x128xf32, #tpu.memory_space<vmem>>, vector<128x128xf32>,
    return
  }
  func.func @transform_0(%arg0: i32) -> (i32, i32) {
    %c0_i32 = arith.constant 0 : i32
    %c0_i32_0 = arith.constant 0 : i32
    return %arg0, %c0_i32 : i32, i32
  }
  func.func @transform_1(%arg0: i32) -> (i32, i32) {
    %c0_i32 = arith.constant 0 : i32
    %c0_i32_0 = arith.constant 0 : i32
    %c0_i32_1 = arith.constant 0 : i32
    return %c0_i32, %c0_i32_0 : i32, i32
  }
  func.func @transform_2(%arg0: i32) -> (i32, i32) {
    %c0_i32 = arith.constant 0 : i32
    %c0_i32_0 = arith.constant 0 : i32
    %c0_i32_1 = arith.constant 0 : i32
    return %c0_i32, %c0_i32_0 : i32, i32
  }
  func.func @transform_3(%arg0: i32) -> (i32, i32) {
    %c0_i32 = arith.constant 0 : i32
    %c0_i32_0 = arith.constant 0 : i32
    %c0_i32_1 = arith.constant 0 : i32
    return %c0_i32, %c0_i32_0 : i32, i32
  }
  func.func @transform_4(%arg0: i32) -> (i32, i32) {
    %c0_i32 = arith.constant 0 : i32
    %c0_i32_0 = arith.constant 0 : i32
    return %arg0, %c0_i32 : i32, i32
  }
}

module attributes {stable_mosaic.version = 11 : i64} {
  func.func @kernel(%arg0: i32, %arg1: i32, %arg2: memref<1x1x34x8xbf16, #tpu.memory_space<vmem>>, %arg3: memref<1x1x34x8xbf16, #tpu.memory_space<vmem>>, %arg4: memref<1x1x34x8xbf16, #tpu.memory_space<vmem>>, %arg5: memref<9x8x8xbf16, #tpu.memory_space<vmem>>, %arg6: memref<1x8xf32, #tpu.memory_space<vmem>>, %arg7: memref<1x1x32x8xf32, #tpu.memory_space<vmem>>, %arg8: memref<1x1x1x8xf32, #tpu.memory_space<vmem>>, %arg9: memref<1x1x1x8xf32, #tpu.memory_space<vmem>>) attributes {dimension_semantics = [#tpu.dimension_semantics<parallel>, #tpu.dimension_semantics<parallel>], iteration_bounds = array<i64: 2, 32>, scalar_prefetch = 0 : i64, scratch_operands = 0 : i64, tpu.core_type = #tpu.core_type<tc>, window_params = [{transform_indices = @transform_0, window_bounds = array<i64: 1, 1, 34, 8>}, {transform_indices = @transform_1, window_bounds = array<i64: 1, 1, 34, 8>}, {transform_indices = @transform_2, window_bounds = array<i64: 1, 1, 34, 8>}, {pipeline_mode = #tpu.pipeline_mode<synchronous>, transform_indices = @transform_3, window_bounds = array<i64: 9, 8, 8>}, {pipeline_mode = #tpu.pipeline_mode<synchronous>, transform_indices = @transform_4, window_bounds = array<i64: 1, 8>}, {transform_indices = @transform_5, window_bounds = array<i64: 1, 1, 32, 8>}, {transform_indices = @transform_6, window_bounds = array<i64: 1, 1, 1, 8>}, {transform_indices = @transform_7, window_bounds = array<i64: 1, 1, 1, 8>}]} {
    %cst = arith.constant 0.000000e+00 : f32
    %0 = vector.broadcast %cst : f32 to vector<32x8xf32>
    %c0 = arith.constant 0 : index
    %c0_0 = arith.constant 0 : index
    %c0_1 = arith.constant 0 : index
    %c0_2 = arith.constant 0 : index
    %1 = vector.load %arg2[%c0, %c0_0, %c0_1, %c0_2] : memref<1x1x34x8xbf16, #tpu.memory_space<vmem>>, vector<1x1x34x8xbf16>
    %2 = vector.shape_cast %1 : vector<1x1x34x8xbf16> to vector<34x8xbf16>
    %3 = vector.extract_strided_slice %2 {offsets = [0, 0], sizes = [32, 8], strides = [1, 1]} : vector<34x8xbf16> to vector<32x8xbf16>
    %c0_3 = arith.constant 0 : index
    %c0_4 = arith.constant 0 : index
    %c0_5 = arith.constant 0 : index
    %4 = vector.load %arg5[%c0_3, %c0_4, %c0_5] : memref<9x8x8xbf16, #tpu.memory_space<vmem>>, vector<1x8x8xbf16>
    %5 = vector.shape_cast %4 : vector<1x8x8xbf16> to vector<8x8xbf16>
    %cst_6 = arith.constant dense<0.000000e+00> : vector<32x8xf32>
    %6 = tpu.matmul %3, %5, %cst_6 {dimension_numbers = #tpu.dot_dimension_numbers<[1], [0], [0], [1], [0, 0, 1, 1], [], []>} : vector<32x8xbf16>, vector<8x8xbf16>, vector<32x8xf32> -> vector<32x8xf32>
    %7 = arith.addf %0, %6 : vector<32x8xf32>
    %8 = vector.extract_strided_slice %2 {offsets = [1, 0], sizes = [32, 8], strides = [1, 1]} : vector<34x8xbf16> to vector<32x8xbf16>
    %c1 = arith.constant 1 : index
    %c0_7 = arith.constant 0 : index
    %c0_8 = arith.constant 0 : index
    %9 = vector.load %arg5[%c1, %c0_7, %c0_8] : memref<9x8x8xbf16, #tpu.memory_space<vmem>>, vector<1x8x8xbf16>
    %10 = vector.shape_cast %9 : vector<1x8x8xbf16> to vector<8x8xbf16>
    %cst_9 = arith.constant dense<0.000000e+00> : vector<32x8xf32>
    %11 = tpu.matmul %8, %10, %cst_9 {dimension_numbers = #tpu.dot_dimension_numbers<[1], [0], [0], [1], [0, 0, 1, 1], [], []>} : vector<32x8xbf16>, vector<8x8xbf16>, vector<32x8xf32> -> vector<32x8xf32>
    %12 = arith.addf %7, %11 : vector<32x8xf32>
    %13 = vector.extract_strided_slice %2 {offsets = [2, 0], sizes = [32, 8], strides = [1, 1]} : vector<34x8xbf16> to vector<32x8xbf16>
    %c2 = arith.constant 2 : index
    %c0_10 = arith.constant 0 : index
    %c0_11 = arith.constant 0 : index
    %14 = vector.load %arg5[%c2, %c0_10, %c0_11] : memref<9x8x8xbf16, #tpu.memory_space<vmem>>, vector<1x8x8xbf16>
    %15 = vector.shape_cast %14 : vector<1x8x8xbf16> to vector<8x8xbf16>
    %cst_12 = arith.constant dense<0.000000e+00> : vector<32x8xf32>
    %16 = tpu.matmul %13, %15, %cst_12 {dimension_numbers = #tpu.dot_dimension_numbers<[1], [0], [0], [1], [0, 0, 1, 1], [], []>} : vector<32x8xbf16>, vector<8x8xbf16>, vector<32x8xf32> -> vector<32x8xf32>
    %17 = arith.addf %12, %16 : vector<32x8xf32>
    %c0_13 = arith.constant 0 : index
    %c0_14 = arith.constant 0 : index
    %c0_15 = arith.constant 0 : index
    %c0_16 = arith.constant 0 : index
    %18 = vector.load %arg3[%c0_13, %c0_14, %c0_15, %c0_16] : memref<1x1x34x8xbf16, #tpu.memory_space<vmem>>, vector<1x1x34x8xbf16>
    %19 = vector.shape_cast %18 : vector<1x1x34x8xbf16> to vector<34x8xbf16>
    %20 = vector.extract_strided_slice %19 {offsets = [0, 0], sizes = [32, 8], strides = [1, 1]} : vector<34x8xbf16> to vector<32x8xbf16>
    %c3 = arith.constant 3 : index
    %c0_17 = arith.constant 0 : index
    %c0_18 = arith.constant 0 : index
    %21 = vector.load %arg5[%c3, %c0_17, %c0_18] : memref<9x8x8xbf16, #tpu.memory_space<vmem>>, vector<1x8x8xbf16>
    %22 = vector.shape_cast %21 : vector<1x8x8xbf16> to vector<8x8xbf16>
    %cst_19 = arith.constant dense<0.000000e+00> : vector<32x8xf32>
    %23 = tpu.matmul %20, %22, %cst_19 {dimension_numbers = #tpu.dot_dimension_numbers<[1], [0], [0], [1], [0, 0, 1, 1], [], []>} : vector<32x8xbf16>, vector<8x8xbf16>, vector<32x8xf32> -> vector<32x8xf32>
    %24 = arith.addf %17, %23 : vector<32x8xf32>
    %25 = vector.extract_strided_slice %19 {offsets = [1, 0], sizes = [32, 8], strides = [1, 1]} : vector<34x8xbf16> to vector<32x8xbf16>
    %c4 = arith.constant 4 : index
    %c0_20 = arith.constant 0 : index
    %c0_21 = arith.constant 0 : index
    %26 = vector.load %arg5[%c4, %c0_20, %c0_21] : memref<9x8x8xbf16, #tpu.memory_space<vmem>>, vector<1x8x8xbf16>
    %27 = vector.shape_cast %26 : vector<1x8x8xbf16> to vector<8x8xbf16>
    %cst_22 = arith.constant dense<0.000000e+00> : vector<32x8xf32>
    %28 = tpu.matmul %25, %27, %cst_22 {dimension_numbers = #tpu.dot_dimension_numbers<[1], [0], [0], [1], [0, 0, 1, 1], [], []>} : vector<32x8xbf16>, vector<8x8xbf16>, vector<32x8xf32> -> vector<32x8xf32>
    %29 = arith.addf %24, %28 : vector<32x8xf32>
    %30 = vector.extract_strided_slice %19 {offsets = [2, 0], sizes = [32, 8], strides = [1, 1]} : vector<34x8xbf16> to vector<32x8xbf16>
    %c5 = arith.constant 5 : index
    %c0_23 = arith.constant 0 : index
    %c0_24 = arith.constant 0 : index
    %31 = vector.load %arg5[%c5, %c0_23, %c0_24] : memref<9x8x8xbf16, #tpu.memory_space<vmem>>, vector<1x8x8xbf16>
    %32 = vector.shape_cast %31 : vector<1x8x8xbf16> to vector<8x8xbf16>
    %cst_25 = arith.constant dense<0.000000e+00> : vector<32x8xf32>
    %33 = tpu.matmul %30, %32, %cst_25 {dimension_numbers = #tpu.dot_dimension_numbers<[1], [0], [0], [1], [0, 0, 1, 1], [], []>} : vector<32x8xbf16>, vector<8x8xbf16>, vector<32x8xf32> -> vector<32x8xf32>
    %34 = arith.addf %29, %33 : vector<32x8xf32>
    %c0_26 = arith.constant 0 : index
    %c0_27 = arith.constant 0 : index
    %c0_28 = arith.constant 0 : index
    %c0_29 = arith.constant 0 : index
    %35 = vector.load %arg4[%c0_26, %c0_27, %c0_28, %c0_29] : memref<1x1x34x8xbf16, #tpu.memory_space<vmem>>, vector<1x1x34x8xbf16>
    %36 = vector.shape_cast %35 : vector<1x1x34x8xbf16> to vector<34x8xbf16>
    %37 = vector.extract_strided_slice %36 {offsets = [0, 0], sizes = [32, 8], strides = [1, 1]} : vector<34x8xbf16> to vector<32x8xbf16>
    %c6 = arith.constant 6 : index
    %c0_30 = arith.constant 0 : index
    %c0_31 = arith.constant 0 : index
    %38 = vector.load %arg5[%c6, %c0_30, %c0_31] : memref<9x8x8xbf16, #tpu.memory_space<vmem>>, vector<1x8x8xbf16>
    %39 = vector.shape_cast %38 : vector<1x8x8xbf16> to vector<8x8xbf16>
    %cst_32 = arith.constant dense<0.000000e+00> : vector<32x8xf32>
    %40 = tpu.matmul %37, %39, %cst_32 {dimension_numbers = #tpu.dot_dimension_numbers<[1], [0], [0], [1], [0, 0, 1, 1], [], []>} : vector<32x8xbf16>, vector<8x8xbf16>, vector<32x8xf32> -> vector<32x8xf32>
    %41 = arith.addf %34, %40 : vector<32x8xf32>
    %42 = vector.extract_strided_slice %36 {offsets = [1, 0], sizes = [32, 8], strides = [1, 1]} : vector<34x8xbf16> to vector<32x8xbf16>
    %c7 = arith.constant 7 : index
    %c0_33 = arith.constant 0 : index
    %c0_34 = arith.constant 0 : index
    %43 = vector.load %arg5[%c7, %c0_33, %c0_34] : memref<9x8x8xbf16, #tpu.memory_space<vmem>>, vector<1x8x8xbf16>
    %44 = vector.shape_cast %43 : vector<1x8x8xbf16> to vector<8x8xbf16>
    %cst_35 = arith.constant dense<0.000000e+00> : vector<32x8xf32>
    %45 = tpu.matmul %42, %44, %cst_35 {dimension_numbers = #tpu.dot_dimension_numbers<[1], [0], [0], [1], [0, 0, 1, 1], [], []>} : vector<32x8xbf16>, vector<8x8xbf16>, vector<32x8xf32> -> vector<32x8xf32>
    %46 = arith.addf %41, %45 : vector<32x8xf32>
    %47 = vector.extract_strided_slice %36 {offsets = [2, 0], sizes = [32, 8], strides = [1, 1]} : vector<34x8xbf16> to vector<32x8xbf16>
    %c8 = arith.constant 8 : index
    %c0_36 = arith.constant 0 : index
    %c0_37 = arith.constant 0 : index
    %48 = vector.load %arg5[%c8, %c0_36, %c0_37] : memref<9x8x8xbf16, #tpu.memory_space<vmem>>, vector<1x8x8xbf16>
    %49 = vector.shape_cast %48 : vector<1x8x8xbf16> to vector<8x8xbf16>
    %cst_38 = arith.constant dense<0.000000e+00> : vector<32x8xf32>
    %50 = tpu.matmul %47, %49, %cst_38 {dimension_numbers = #tpu.dot_dimension_numbers<[1], [0], [0], [1], [0, 0, 1, 1], [], []>} : vector<32x8xbf16>, vector<8x8xbf16>, vector<32x8xf32> -> vector<32x8xf32>
    %51 = arith.addf %46, %50 : vector<32x8xf32>
    %c0_39 = arith.constant 0 : index
    %c0_40 = arith.constant 0 : index
    %52 = vector.load %arg6[%c0_39, %c0_40] : memref<1x8xf32, #tpu.memory_space<vmem>>, vector<1x8xf32>
    %53 = vector.broadcast %52 : vector<1x8xf32> to vector<32x8xf32>
    %54 = arith.addf %51, %53 : vector<32x8xf32>
    %c0_41 = arith.constant 0 : index
    %c0_42 = arith.constant 0 : index
    %c0_43 = arith.constant 0 : index
    %c0_44 = arith.constant 0 : index
    %55 = vector.load %arg7[%c0_41, %c0_42, %c0_43, %c0_44] : memref<1x1x32x8xf32, #tpu.memory_space<vmem>>, vector<1x1x32x8xf32>
    %56 = vector.shape_cast %55 : vector<1x1x32x8xf32> to vector<32x8xf32>
    %57 = vector.shape_cast %54 : vector<32x8xf32> to vector<1x1x32x8xf32>
    tpu.vector_store %arg7[%c0_41, %c0_42, %c0_43, %c0_44], %57 {strides = array<i32>} : memref<1x1x32x8xf32, #tpu.memory_space<vmem>>, vector<1x1x32x8xf32>,
    %cst_45 = arith.constant dense<0.000000e+00> : vector<8xf32>
    %58 = vector.multi_reduction <add>, %54, %cst_45 [0] : vector<32x8xf32> to vector<8xf32>
    %59 = vector.shape_cast %58 : vector<8xf32> to vector<1x8xf32>
    %c0_46 = arith.constant 0 : index
    %c0_47 = arith.constant 0 : index
    %c0_48 = arith.constant 0 : index
    %c0_49 = arith.constant 0 : index
    %60 = vector.load %arg8[%c0_46, %c0_47, %c0_48, %c0_49] : memref<1x1x1x8xf32, #tpu.memory_space<vmem>>, vector<1x1x1x8xf32>
    %61 = vector.shape_cast %60 : vector<1x1x1x8xf32> to vector<1x8xf32>
    %62 = vector.shape_cast %59 : vector<1x8xf32> to vector<1x1x1x8xf32>
    tpu.vector_store %arg8[%c0_46, %c0_47, %c0_48, %c0_49], %62 {strides = array<i32>} : memref<1x1x1x8xf32, #tpu.memory_space<vmem>>, vector<1x1x1x8xf32>,
    %63 = arith.mulf %54, %54 : vector<32x8xf32>
    %cst_50 = arith.constant dense<0.000000e+00> : vector<8xf32>
    %64 = vector.multi_reduction <add>, %63, %cst_50 [0] : vector<32x8xf32> to vector<8xf32>
    %65 = vector.shape_cast %64 : vector<8xf32> to vector<1x8xf32>
    %c0_51 = arith.constant 0 : index
    %c0_52 = arith.constant 0 : index
    %c0_53 = arith.constant 0 : index
    %c0_54 = arith.constant 0 : index
    %66 = vector.load %arg9[%c0_51, %c0_52, %c0_53, %c0_54] : memref<1x1x1x8xf32, #tpu.memory_space<vmem>>, vector<1x1x1x8xf32>
    %67 = vector.shape_cast %66 : vector<1x1x1x8xf32> to vector<1x8xf32>
    %68 = vector.shape_cast %65 : vector<1x8xf32> to vector<1x1x1x8xf32>
    tpu.vector_store %arg9[%c0_51, %c0_52, %c0_53, %c0_54], %68 {strides = array<i32>} : memref<1x1x1x8xf32, #tpu.memory_space<vmem>>, vector<1x1x1x8xf32>,
    return
  }
  func.func @transform_0(%arg0: i32, %arg1: i32) -> (i32, i32, i32, i32) {
    %c0_i32 = arith.constant 0 : i32
    %0 = arith.addi %arg1, %c0_i32 : i32
    %c0_i32_0 = arith.constant 0 : i32
    %c0_i32_1 = arith.constant 0 : i32
    %c0_i32_2 = arith.constant 0 : i32
    return %arg0, %0, %c0_i32_0, %c0_i32_1 : i32, i32, i32, i32
  }
  func.func @transform_1(%arg0: i32, %arg1: i32) -> (i32, i32, i32, i32) {
    %c1_i32 = arith.constant 1 : i32
    %0 = arith.addi %arg1, %c1_i32 : i32
    %c0_i32 = arith.constant 0 : i32
    %c0_i32_0 = arith.constant 0 : i32
    %c0_i32_1 = arith.constant 0 : i32
    return %arg0, %0, %c0_i32, %c0_i32_0 : i32, i32, i32, i32
  }
  func.func @transform_2(%arg0: i32, %arg1: i32) -> (i32, i32, i32, i32) {
    %c2_i32 = arith.constant 2 : i32
    %0 = arith.addi %arg1, %c2_i32 : i32
    %c0_i32 = arith.constant 0 : i32
    %c0_i32_0 = arith.constant 0 : i32
    %c0_i32_1 = arith.constant 0 : i32
    return %arg0, %0, %c0_i32, %c0_i32_0 : i32, i32, i32, i32
  }
  func.func @transform_3(%arg0: i32, %arg1: i32) -> (i32, i32, i32) {
    %c0_i32 = arith.constant 0 : i32
    %c0_i32_0 = arith.constant 0 : i32
    %c0_i32_1 = arith.constant 0 : i32
    %c0_i32_2 = arith.constant 0 : i32
    return %c0_i32, %c0_i32_0, %c0_i32_1 : i32, i32, i32
  }
  func.func @transform_4(%arg0: i32, %arg1: i32) -> (i32, i32) {
    %c0_i32 = arith.constant 0 : i32
    %c0_i32_0 = arith.constant 0 : i32
    %c0_i32_1 = arith.constant 0 : i32
    return %c0_i32, %c0_i32_0 : i32, i32
  }
  func.func @transform_5(%arg0: i32, %arg1: i32) -> (i32, i32, i32, i32) {
    %c0_i32 = arith.constant 0 : i32
    %c0_i32_0 = arith.constant 0 : i32
    %c0_i32_1 = arith.constant 0 : i32
    return %arg0, %arg1, %c0_i32, %c0_i32_0 : i32, i32, i32, i32
  }
  func.func @transform_6(%arg0: i32, %arg1: i32) -> (i32, i32, i32, i32) {
    %c0_i32 = arith.constant 0 : i32
    %c0_i32_0 = arith.constant 0 : i32
    %c0_i32_1 = arith.constant 0 : i32
    return %arg0, %arg1, %c0_i32, %c0_i32_0 : i32, i32, i32, i32
  }
  func.func @transform_7(%arg0: i32, %arg1: i32) -> (i32, i32, i32, i32) {
    %c0_i32 = arith.constant 0 : i32
    %c0_i32_0 = arith.constant 0 : i32
    %c0_i32_1 = arith.constant 0 : i32
    return %arg0, %arg1, %c0_i32, %c0_i32_0 : i32, i32, i32, i32
  }
}

module attributes {stable_mosaic.version = 11 : i64} {
  func.func @kernel(%arg0: i32, %arg1: i32, %arg2: memref<1x1x16x4xbf16, #tpu.memory_space<vmem>>, %arg3: memref<1x4x8xbf16, #tpu.memory_space<vmem>>, %arg4: memref<1x8xf32, #tpu.memory_space<vmem>>, %arg5: memref<1x1x16x8xf32, #tpu.memory_space<vmem>>, %arg6: memref<1x1x1x8xf32, #tpu.memory_space<vmem>>, %arg7: memref<1x1x1x8xf32, #tpu.memory_space<vmem>>) attributes {dimension_semantics = [#tpu.dimension_semantics<parallel>, #tpu.dimension_semantics<parallel>], iteration_bounds = array<i64: 2, 16>, scalar_prefetch = 0 : i64, scratch_operands = 0 : i64, tpu.core_type = #tpu.core_type<tc>, window_params = [{transform_indices = @transform_0, window_bounds = array<i64: 1, 1, 16, 4>}, {pipeline_mode = #tpu.pipeline_mode<synchronous>, transform_indices = @transform_1, window_bounds = array<i64: 1, 4, 8>}, {pipeline_mode = #tpu.pipeline_mode<synchronous>, transform_indices = @transform_2, window_bounds = array<i64: 1, 8>}, {transform_indices = @transform_3, window_bounds = array<i64: 1, 1, 16, 8>}, {transform_indices = @transform_4, window_bounds = array<i64: 1, 1, 1, 8>}, {transform_indices = @transform_5, window_bounds = array<i64: 1, 1, 1, 8>}]} {
    %cst = arith.constant 0.000000e+00 : f32
    %0 = vector.broadcast %cst : f32 to vector<16x8xf32>
    %c0 = arith.constant 0 : index
    %c0_0 = arith.constant 0 : index
    %c0_1 = arith.constant 0 : index
    %c0_2 = arith.constant 0 : index
    %1 = vector.load %arg2[%c0, %c0_0, %c0_1, %c0_2] : memref<1x1x16x4xbf16, #tpu.memory_space<vmem>>, vector<1x1x16x4xbf16>
    %2 = vector.shape_cast %1 : vector<1x1x16x4xbf16> to vector<16x4xbf16>
    %c0_3 = arith.constant 0 : index
    %c0_4 = arith.constant 0 : index
    %c0_5 = arith.constant 0 : index
    %3 = vector.load %arg3[%c0_3, %c0_4, %c0_5] : memref<1x4x8xbf16, #tpu.memory_space<vmem>>, vector<1x4x8xbf16>
    %4 = vector.shape_cast %3 : vector<1x4x8xbf16> to vector<4x8xbf16>
    %cst_6 = arith.constant dense<0.000000e+00> : vector<16x8xf32>
    %5 = tpu.matmul %2, %4, %cst_6 {dimension_numbers = #tpu.dot_dimension_numbers<[1], [0], [0], [1], [0, 0, 1, 1], [], []>} : vector<16x4xbf16>, vector<4x8xbf16>, vector<16x8xf32> -> vector<16x8xf32>
    %6 = arith.addf %0, %5 : vector<16x8xf32>
    %c0_7 = arith.constant 0 : index
    %c0_8 = arith.constant 0 : index
    %7 = vector.load %arg4[%c0_7, %c0_8] : memref<1x8xf32, #tpu.memory_space<vmem>>, vector<1x8xf32>
    %8 = vector.broadcast %7 : vector<1x8xf32> to vector<16x8xf32>
    %9 = arith.addf %6, %8 : vector<16x8xf32>
    %c0_9 = arith.constant 0 : index
    %c0_10 = arith.constant 0 : index
    %c0_11 = arith.constant 0 : index
    %c0_12 = arith.constant 0 : index
    %10 = vector.load %arg5[%c0_9, %c0_10, %c0_11, %c0_12] : memref<1x1x16x8xf32, #tpu.memory_space<vmem>>, vector<1x1x16x8xf32>
    %11 = vector.shape_cast %10 : vector<1x1x16x8xf32> to vector<16x8xf32>
    %12 = vector.shape_cast %9 : vector<16x8xf32> to vector<1x1x16x8xf32>
    tpu.vector_store %arg5[%c0_9, %c0_10, %c0_11, %c0_12], %12 {strides = array<i32>} : memref<1x1x16x8xf32, #tpu.memory_space<vmem>>, vector<1x1x16x8xf32>,
    %cst_13 = arith.constant dense<0.000000e+00> : vector<8xf32>
    %13 = vector.multi_reduction <add>, %9, %cst_13 [0] : vector<16x8xf32> to vector<8xf32>
    %14 = vector.shape_cast %13 : vector<8xf32> to vector<1x8xf32>
    %c0_14 = arith.constant 0 : index
    %c0_15 = arith.constant 0 : index
    %c0_16 = arith.constant 0 : index
    %c0_17 = arith.constant 0 : index
    %15 = vector.load %arg6[%c0_14, %c0_15, %c0_16, %c0_17] : memref<1x1x1x8xf32, #tpu.memory_space<vmem>>, vector<1x1x1x8xf32>
    %16 = vector.shape_cast %15 : vector<1x1x1x8xf32> to vector<1x8xf32>
    %17 = vector.shape_cast %14 : vector<1x8xf32> to vector<1x1x1x8xf32>
    tpu.vector_store %arg6[%c0_14, %c0_15, %c0_16, %c0_17], %17 {strides = array<i32>} : memref<1x1x1x8xf32, #tpu.memory_space<vmem>>, vector<1x1x1x8xf32>,
    %18 = arith.mulf %9, %9 : vector<16x8xf32>
    %cst_18 = arith.constant dense<0.000000e+00> : vector<8xf32>
    %19 = vector.multi_reduction <add>, %18, %cst_18 [0] : vector<16x8xf32> to vector<8xf32>
    %20 = vector.shape_cast %19 : vector<8xf32> to vector<1x8xf32>
    %c0_19 = arith.constant 0 : index
    %c0_20 = arith.constant 0 : index
    %c0_21 = arith.constant 0 : index
    %c0_22 = arith.constant 0 : index
    %21 = vector.load %arg7[%c0_19, %c0_20, %c0_21, %c0_22] : memref<1x1x1x8xf32, #tpu.memory_space<vmem>>, vector<1x1x1x8xf32>
    %22 = vector.shape_cast %21 : vector<1x1x1x8xf32> to vector<1x8xf32>
    %23 = vector.shape_cast %20 : vector<1x8xf32> to vector<1x1x1x8xf32>
    tpu.vector_store %arg7[%c0_19, %c0_20, %c0_21, %c0_22], %23 {strides = array<i32>} : memref<1x1x1x8xf32, #tpu.memory_space<vmem>>, vector<1x1x1x8xf32>,
    return
  }
  func.func @transform_0(%arg0: i32, %arg1: i32) -> (i32, i32, i32, i32) {
    %c0_i32 = arith.constant 0 : i32
    %0 = arith.addi %arg1, %c0_i32 : i32
    %c0_i32_0 = arith.constant 0 : i32
    %c0_i32_1 = arith.constant 0 : i32
    %c0_i32_2 = arith.constant 0 : i32
    return %arg0, %0, %c0_i32_0, %c0_i32_1 : i32, i32, i32, i32
  }
  func.func @transform_1(%arg0: i32, %arg1: i32) -> (i32, i32, i32) {
    %c0_i32 = arith.constant 0 : i32
    %c0_i32_0 = arith.constant 0 : i32
    %c0_i32_1 = arith.constant 0 : i32
    %c0_i32_2 = arith.constant 0 : i32
    return %c0_i32, %c0_i32_0, %c0_i32_1 : i32, i32, i32
  }
  func.func @transform_2(%arg0: i32, %arg1: i32) -> (i32, i32) {
    %c0_i32 = arith.constant 0 : i32
    %c0_i32_0 = arith.constant 0 : i32
    %c0_i32_1 = arith.constant 0 : i32
    return %c0_i32, %c0_i32_0 : i32, i32
  }
  func.func @transform_3(%arg0: i32, %arg1: i32) -> (i32, i32, i32, i32) {
    %c0_i32 = arith.constant 0 : i32
    %c0_i32_0 = arith.constant 0 : i32
    %c0_i32_1 = arith.constant 0 : i32
    return %arg0, %arg1, %c0_i32, %c0_i32_0 : i32, i32, i32, i32
  }
  func.func @transform_4(%arg0: i32, %arg1: i32) -> (i32, i32, i32, i32) {
    %c0_i32 = arith.constant 0 : i32
    %c0_i32_0 = arith.constant 0 : i32
    %c0_i32_1 = arith.constant 0 : i32
    return %arg0, %arg1, %c0_i32, %c0_i32_0 : i32, i32, i32, i32
  }
  func.func @transform_5(%arg0: i32, %arg1: i32) -> (i32, i32, i32, i32) {
    %c0_i32 = arith.constant 0 : i32
    %c0_i32_0 = arith.constant 0 : i32
    %c0_i32_1 = arith.constant 0 : i32
    return %arg0, %arg1, %c0_i32, %c0_i32_0 : i32, i32, i32, i32
  }
}

module attributes {stable_mosaic.version = 11 : i64} {
  func.func @_bn_add_prelu_kernel(%arg0: i32, %arg1: memref<128x128xf32, #tpu.memory_space<vmem>>, %arg2: memref<128x128xf32, #tpu.memory_space<vmem>>, %arg3: memref<1x128xf32, #tpu.memory_space<vmem>>, %arg4: memref<1x128xf32, #tpu.memory_space<vmem>>, %arg5: memref<1x128xf32, #tpu.memory_space<vmem>>, %arg6: memref<1x128xf32, #tpu.memory_space<vmem>>, %arg7: memref<1x128xf32, #tpu.memory_space<vmem>>, %arg8: memref<1x128xf32, #tpu.memory_space<vmem>>, %arg9: memref<128x128xf32, #tpu.memory_space<vmem>>) attributes {dimension_semantics = [#tpu.dimension_semantics<parallel>], iteration_bounds = array<i64: 1>, scalar_prefetch = 0 : i64, scratch_operands = 0 : i64, tpu.core_type = #tpu.core_type<tc>, window_params = [{transform_indices = @transform_0, window_bounds = array<i64: 128, 128>}, {transform_indices = @transform_1, window_bounds = array<i64: 128, 128>}, {pipeline_mode = #tpu.pipeline_mode<synchronous>, transform_indices = @transform_2, window_bounds = array<i64: 1, 128>}, {pipeline_mode = #tpu.pipeline_mode<synchronous>, transform_indices = @transform_3, window_bounds = array<i64: 1, 128>}, {pipeline_mode = #tpu.pipeline_mode<synchronous>, transform_indices = @transform_4, window_bounds = array<i64: 1, 128>}, {pipeline_mode = #tpu.pipeline_mode<synchronous>, transform_indices = @transform_5, window_bounds = array<i64: 1, 128>}, {pipeline_mode = #tpu.pipeline_mode<synchronous>, transform_indices = @transform_6, window_bounds = array<i64: 1, 128>}, {pipeline_mode = #tpu.pipeline_mode<synchronous>, transform_indices = @transform_7, window_bounds = array<i64: 1, 128>}, {transform_indices = @transform_8, window_bounds = array<i64: 128, 128>}]} {
    %c0 = arith.constant 0 : index
    %c0_0 = arith.constant 0 : index
    %0 = vector.load %arg1[%c0, %c0_0] : memref<128x128xf32, #tpu.memory_space<vmem>>, vector<128x128xf32>
    %c0_1 = arith.constant 0 : index
    %c0_2 = arith.constant 0 : index
    %1 = vector.load %arg3[%c0_1, %c0_2] : memref<1x128xf32, #tpu.memory_space<vmem>>, vector<1x128xf32>
    %2 = vector.broadcast %1 : vector<1x128xf32> to vector<128x128xf32>
    %3 = arith.mulf %0, %2 : vector<128x128xf32>
    %c0_3 = arith.constant 0 : index
    %c0_4 = arith.constant 0 : index
    %4 = vector.load %arg4[%c0_3, %c0_4] : memref<1x128xf32, #tpu.memory_space<vmem>>, vector<1x128xf32>
    %5 = vector.broadcast %4 : vector<1x128xf32> to vector<128x128xf32>
    %6 = arith.addf %3, %5 : vector<128x128xf32>
    %cst = arith.constant 0.000000e+00 : f32
    %7 = vector.broadcast %cst : f32 to vector<128x128xf32>
    %8 = arith.cmpf oge, %6, %7 : vector<128x128xf32>
    %c0_5 = arith.constant 0 : index
    %c0_6 = arith.constant 0 : index
    %9 = vector.load %arg5[%c0_5, %c0_6] : memref<1x128xf32, #tpu.memory_space<vmem>>, vector<1x128xf32>
    %10 = vector.broadcast %9 : vector<1x128xf32> to vector<128x128xf32>
    %11 = arith.mulf %10, %6 : vector<128x128xf32>
    %12 = arith.select %8, %6, %11 : vector<128x128xi1>, vector<128x128xf32>
    %c0_7 = arith.constant 0 : index
    %c0_8 = arith.constant 0 : index
    %13 = vector.load %arg2[%c0_7, %c0_8] : memref<128x128xf32, #tpu.memory_space<vmem>>, vector<128x128xf32>
    %c0_9 = arith.constant 0 : index
    %c0_10 = arith.constant 0 : index
    %14 = vector.load %arg6[%c0_9, %c0_10] : memref<1x128xf32, #tpu.memory_space<vmem>>, vector<1x128xf32>
    %15 = vector.broadcast %14 : vector<1x128xf32> to vector<128x128xf32>
    %16 = arith.mulf %13, %15 : vector<128x128xf32>
    %c0_11 = arith.constant 0 : index
    %c0_12 = arith.constant 0 : index
    %17 = vector.load %arg7[%c0_11, %c0_12] : memref<1x128xf32, #tpu.memory_space<vmem>>, vector<1x128xf32>
    %18 = vector.broadcast %17 : vector<1x128xf32> to vector<128x128xf32>
    %19 = arith.addf %16, %18 : vector<128x128xf32>
    %20 = arith.addf %12, %19 : vector<128x128xf32>
    %cst_13 = arith.constant 0.000000e+00 : f32
    %21 = vector.broadcast %cst_13 : f32 to vector<128x128xf32>
    %22 = arith.cmpf oge, %20, %21 : vector<128x128xf32>
    %c0_14 = arith.constant 0 : index
    %c0_15 = arith.constant 0 : index
    %23 = vector.load %arg8[%c0_14, %c0_15] : memref<1x128xf32, #tpu.memory_space<vmem>>, vector<1x128xf32>
    %24 = vector.broadcast %23 : vector<1x128xf32> to vector<128x128xf32>
    %25 = arith.mulf %24, %20 : vector<128x128xf32>
    %26 = arith.select %22, %20, %25 : vector<128x128xi1>, vector<128x128xf32>
    %c0_16 = arith.constant 0 : index
    %c0_17 = arith.constant 0 : index
    %27 = vector.load %arg9[%c0_16, %c0_17] : memref<128x128xf32, #tpu.memory_space<vmem>>, vector<128x128xf32>
    tpu.vector_store %arg9[%c0_16, %c0_17], %26 {strides = array<i32>} : memref<128x128xf32, #tpu.memory_space<vmem>>, vector<128x128xf32>,
    return
  }
  func.func @transform_0(%arg0: i32) -> (i32, i32) {
    %c0_i32 = arith.constant 0 : i32
    %c0_i32_0 = arith.constant 0 : i32
    return %arg0, %c0_i32 : i32, i32
  }
  func.func @transform_1(%arg0: i32) -> (i32, i32) {
    %c0_i32 = arith.constant 0 : i32
    %c0_i32_0 = arith.constant 0 : i32
    return %arg0, %c0_i32 : i32, i32
  }
  func.func @transform_2(%arg0: i32) -> (i32, i32) {
    %c0_i32 = arith.constant 0 : i32
    %c0_i32_0 = arith.constant 0 : i32
    %c0_i32_1 = arith.constant 0 : i32
    return %c0_i32, %c0_i32_0 : i32, i32
  }
  func.func @transform_3(%arg0: i32) -> (i32, i32) {
    %c0_i32 = arith.constant 0 : i32
    %c0_i32_0 = arith.constant 0 : i32
    %c0_i32_1 = arith.constant 0 : i32
    return %c0_i32, %c0_i32_0 : i32, i32
  }
  func.func @transform_4(%arg0: i32) -> (i32, i32) {
    %c0_i32 = arith.constant 0 : i32
    %c0_i32_0 = arith.constant 0 : i32
    %c0_i32_1 = arith.constant 0 : i32
    return %c0_i32, %c0_i32_0 : i32, i32
  }
  func.func @transform_5(%arg0: i32) -> (i32, i32) {
    %c0_i32 = arith.constant 0 : i32
    %c0_i32_0 = arith.constant 0 : i32
    %c0_i32_1 = arith.constant 0 : i32
    return %c0_i32, %c0_i32_0 : i32, i32
  }
  func.func @transform_6(%arg0: i32) -> (i32, i32) {
    %c0_i32 = arith.constant 0 : i32
    %c0_i32_0 = arith.constant 0 : i32
    %c0_i32_1 = arith.constant 0 : i32
    return %c0_i32, %c0_i32_0 : i32, i32
  }
  func.func @transform_7(%arg0: i32) -> (i32, i32) {
    %c0_i32 = arith.constant 0 : i32
    %c0_i32_0 = arith.constant 0 : i32
    %c0_i32_1 = arith.constant 0 : i32
    return %c0_i32, %c0_i32_0 : i32, i32
  }
  func.func @transform_8(%arg0: i32) -> (i32, i32) {
    %c0_i32 = arith.constant 0 : i32
    %c0_i32_0 = arith.constant 0 : i32
    return %arg0, %c0_i32 : i32, i32
  }
}

</mosaic_0001>

<bundles_post_ra>
// kernel: tile.41
= control target key start
LH: loop header
LB: loop body
LE: loop exit
PB: predicated region body
PF: predicated region fallthrough
CT: control target
= control target key end

     0   :  { %s22_s0 = inlined_call_operand.vmem [shape: f32[8], index: 0, kind: input, shape index: {}]   ;;  %s23_s1 = inlined_call_operand.vmem [shape: f32[4,8], index: 1, kind: output, shape index: {}]  }
   0x1   :  { %v4_v0 = vld [vmem:[%s22_s0] ss:$0 sm:$0xff] }
   0x2   :  { %5 = vst [vmem:[%s23_s1] sm:$0xf] %v4_v0 }

// kernel: tile.48
= control target key start
LH: loop header
LB: loop body
LE: loop exit
PB: predicated region body
PF: predicated region fallthrough
CT: control target
= control target key end

     0   :  { %vm7_vm0 = vcmask 64512   ;;  %s37_s8 = smov 8   ;;  %s38_s9 = smov 16   ;;  %vm13_vm1 = vcmask 261312   ;;  %vm19_vm2 = vcmask 195712   ;;  %vm25_vm3 = vcmask 130112   ;;  %s55_s0 = inlined_call_operand.vmem [shape: f32[4,8], index: 0, kind: input, shape index: {}]   ;;  %s56_s1 = inlined_call_operand.vmem [shape: f32[32], index: 1, kind: output, shape index: {}]  }
   0x1   :  { %v4_v0 = vld [vmem:[%s55_s0] sm:$0xf]  ;;  %s36_s0 = smov 24  }
   0x2   :  { %5 = vst [vmem:[#allocation1] sm:$0xf] %v4_v0 }
   0x9   :  { %v10_v1 = vld [vmem:[#allocation1 + $0x3] sm:$0x1]   ;;  %v22_v2 = vld [vmem:[#allocation1 + $0x1] sm:$0x1]   ;;  %v6_v3 = vld [vmem:[#allocation1] sm:$0x1]  }
   0xa   :  { %11 = vrot.lane.b32.xlu0 %v10_v1, %s36_s0  ;;  %23 = vrot.lane.b32.xlu1 %v22_v2, %s37_s8  ;;  %v16_v4 = vld [vmem:[#allocation1 + $0x2] sm:$0x1]   ;;  %8 = vst.msk [vmem:[#allocation0] sm:$0x1] %vm7_vm0, %v6_v3  }
   0xe   :  { %17 = vrot.lane.b32.xlu0 %v16_v4, %s38_s9 }
  0x7c   :  { %v12_v5 = vpop.permute.xlu0 %11   ;;  %v24_v6 = vpop.permute.xlu1 %23  }
  0x7d   :  { %14 = vst.msk [vmem:[#allocation0] sm:$0x1] %vm13_vm1, %v12_v5  }
  0x80   :  { %v18_v7 = vpop.permute.xlu0 %17  }
  0x81   :  { %20 = vst.msk [vmem:[#allocation0] sm:$0x1] %vm19_vm2, %v18_v7  }
  0x82   :  { %26 = vst.msk [vmem:[#allocation0] sm:$0x1] %vm25_vm3, %v24_v6  }
  0x89   :  { %v30_v8 = vld [vmem:[#allocation0] sm:$0x1] }
  0x8a   :  { %32 = vst [vmem:[%s56_s1] sm:$0x1] %v30_v8 }

// kernel: tile.49
= control target key start
LH: loop header
LB: loop body
LE: loop exit
PB: predicated region body
PF: predicated region fallthrough
CT: control target
= control target key end

     0   :  { %s22_s0 = inlined_call_operand.vmem [shape: f32[32], index: 0, kind: input, shape index: {}]   ;;  %s23_s1 = inlined_call_operand.vmem [shape: f32[4,32], index: 1, kind: output, shape index: {}]  }
   0x1   :  { %v4_v0 = vld [vmem:[%s22_s0] ss:$0 sm:$0xff] }
   0x2   :  { %5 = vst [vmem:[%s23_s1] sm:$0xf] %v4_v0 }

// kernel: tile.50
= control target key start
LH: loop header
LB: loop body
LE: loop exit
PB: predicated region body
PF: predicated region fallthrough
CT: control target
= control target key end

     0   :  { %vm7_vm0 = vcmask 261120   ;;  %s37_s8 = smov 32   ;;  %s38_s9 = smov 64   ;;  %vm13_vm1 = vcmask 1048320   ;;  %vm19_vm2 = vcmask 785920   ;;  %vm25_vm3 = vcmask 523520   ;;  %s55_s0 = inlined_call_operand.vmem [shape: f32[4,32], index: 0, kind: input, shape index: {}]   ;;  %s56_s1 = inlined_call_operand.vmem [shape: f32[1,128], index: 1, kind: output, shape index: {}]  }
   0x1   :  { %v4_v0 = vld [vmem:[%s55_s0] sm:$0xf]  ;;  %s36_s0 = smov 96  }
   0x2   :  { %5 = vst [vmem:[#allocation1] sm:$0xf] %v4_v0 }
   0x9   :  { %v10_v1 = vld [vmem:[#allocation1 + $0x3] sm:$0x1]   ;;  %v22_v2 = vld [vmem:[#allocation1 + $0x1] sm:$0x1]   ;;  %v6_v3 = vld [vmem:[#allocation1] sm:$0x1]  }
   0xa   :  { %11 = vrot.lane.b32.xlu0 %v10_v1, %s36_s0  ;;  %23 = vrot.lane.b32.xlu1 %v22_v2, %s37_s8  ;;  %v16_v4 = vld [vmem:[#allocation1 + $0x2] sm:$0x1]   ;;  %8 = vst.msk [vmem:[#allocation0] sm:$0x1] %vm7_vm0, %v6_v3  }
   0xe   :  { %17 = vrot.lane.b32.xlu0 %v16_v4, %s38_s9 }
  0x7c   :  { %v12_v5 = vpop.permute.xlu0 %11   ;;  %v24_v6 = vpop.permute.xlu1 %23  }
  0x7d   :  { %14 = vst.msk [vmem:[#allocation0] sm:$0x1] %vm13_vm1, %v12_v5  }
  0x80   :  { %v18_v7 = vpop.permute.xlu0 %17  }
  0x81   :  { %20 = vst.msk [vmem:[#allocation0] sm:$0x1] %vm19_vm2, %v18_v7  }
  0x82   :  { %26 = vst.msk [vmem:[#allocation0] sm:$0x1] %vm25_vm3, %v24_v6  }
  0x89   :  { %v30_v8 = vld [vmem:[#allocation0] sm:$0x1] }
  0x8a   :  { %32 = vst [vmem:[%s56_s1] sm:$0x1] %v30_v8 }

// kernel: deconv_res_block.5
= control target key start
LH: loop header
LB: loop body
LE: loop exit
PB: predicated region body
PF: predicated region fallthrough
CT: control target
= control target key end

     0   :  { %s1030_s21 = smov 0   ;;  %s1032_s22 = smov 0   ;;  %s1139_s0 = inlined_call_operand.vmem [shape: bf16[2,17,17,4], index: 0, kind: input, shape index: {}, may-alias: {0,1}]   ;;  %s1140_s1 = inlined_call_operand.vmem [shape: bf16[2,17,17,4], index: 1, kind: input, shape index: {}, may-alias: {0,1}]   ;;  %s1141_s2 = inlined_call_operand.vmem [shape: bf16[4,4,32], index: 2, kind: input, shape index: {}]   ;;  %s1142_s3 = inlined_call_operand.vmem [shape: f32[1,32], index: 3, kind: input, shape index: {}]   ;;  %s1143_s4 = inlined_call_operand.vmem [shape: f32[2,16,16,32], index: 4, kind: output, shape index: {0}]   ;;  %s1144_s5 = inlined_call_operand.vmem [shape: f32[2,16,1,32], index: 5, kind: output, shape index: {1}]   ;;  %s1145_s6 = inlined_call_operand.vmem [shape: f32[2,16,1,32], index: 6, kind: output, shape index: {2}]  }
   0x1   :  { %s1034_s23 = smov 0   ;;  %s1036_s24 = smov 0  }
   0x2   :  { %s1038_s25 = smov 0  }
   0x3 LB: > { %s26_s26 = sadd.s32 1, %s983_s23  ;;  %s29_s27 = sadd.s32 1, %s987_s24  ;;  %s991_s25 = sphi %s1038_s25, %s17_s25   ;;  %s987_s24 = sphi %s1036_s24, %s1149_s24   ;;  %s983_s23 = sphi %s1034_s23, %s1148_s23   ;;  %s979_s22 = sphi %s1032_s22, %s1147_s22   ;;  %s975_s21 = sphi %s1030_s21, %s1146_s21  }
   0x4   : > { %p27_p0 = scmp.ge.s32.totalorder %s26_s26, 16  ;;  %p850_p1 = scmp.ge.s32.totalorder %s991_s25, 1 }
   0x5   : > { %p261_p2 = scmp.lt.s32.totalorder %s991_s25, 33 }
   0x6   : > { %s1151_s26 = smov (%p27_p0, %s26_s26), 0  ;;  %s1153_s27 = smov (!%p27_p0, %s29_s27), %s987_s24 }
   0x7   : > { %p262_p3 = pnand %p850_p1, %p261_p2  ;;  %p31_p4 = scmp.ge.s32.totalorder %s1153_s27, 2 }
   0x8   : > { %v858_v0 = vld [vmem:[%s1141_s2 + $0x2] sm:$0x3] (!%p262_p3)  ;;  %vm398_vm0 = vcmask (!%p262_p3), 1041408   ;;  %v370_v1 = vld [vmem:[%s1141_s2] sm:$0x3] (!%p262_p3)  ;;  %v993_v2 = vmov (!%p262_p3), 0.0  }
   0x9   : > { %s1155_s27 = smov (%p31_p4, %s1153_s27), 0  ;;  %265 = sbr.rel (%p262_p3) target bundleno = 278 (0x116), region = 36 }
   0xa   : > { %880 = vmatprep.subr.bf16.mxu0 (!%p262_p3), %v993_v2  ;;  %886 = vmatprep.subr.bf16.mxu1 (!%p262_p3), %v993_v2  ;;  %v400_v3 = vsel (!%p262_p3), %vm398_vm0, %v858_v0, 0  ;;  %v446_v4 = vsel (!%p262_p3), %vm398_vm0, %v370_v1, 0  ;;  %p323_p5 = scmp.lt.s32.totalorder (!%p262_p3), %s979_s22, 1  ;;  %p325_p6 = scmp.lt.s32.totalorder (!%p262_p3), %s975_s21, 16  ;;  %vm994_vm1 = vmmov (!%p262_p3), 0   ;;  %vm394_vm2 = vcmask (!%p262_p3), 31744  }
   0xb   : > { %881 = vmatpush3.bf16.msra.mxu0 (!%p262_p3), %v400_v3  ;;  %887 = vmatpush3.bf16.msra.mxu1 (!%p262_p3), %v446_v4  ;;  %s332_s10 = sadd.s32 (!%p262_p3), 1, %s975_s21  ;;  %v866_v5 = vld [vmem:[%s1141_s2 + $0x6] sm:$0x3] (!%p262_p3)  ;;  %v863_v12 = vld [vmem:[%s1141_s2 + $0x4] sm:$0x3] (!%p262_p3)  ;;  %p345_p8 = scmp.lt.s32.totalorder (!%p262_p3), %s975_s21, 15 }
   0xc   : > { %888 = vmatprep.mubr.msk.bf16.mxu1 (!%p262_p3), %vm994_vm1, %v993_v2  ;;  %882 = vmatprep.mubr.msk.bf16.mxu0 (!%p262_p3), %vm994_vm1, %v993_v2  ;;  %p335_p7 = scmp.lt.s32.totalorder (!%p262_p3), %s332_s10, 16  ;;  %v568_v6 = vsel (!%p262_p3), %vm398_vm0, %v866_v5, 0  ;;  %vm381_vm3 = vsmask.f32 (!%p262_p3), 7424  ;;  %v503_v16 = vsel (!%p262_p3), %vm398_vm0, %v863_v12, 0  ;;  %vm622_vm4 = vcmask (!%p262_p3), 261120  }
   0xd   : > { %892 = vmatprep.subr.bf16.mxu0 (!%p262_p3), %v993_v2  ;;  %898 = vmatprep.subr.bf16.mxu1 (!%p262_p3), %v993_v2  ;;  %v869_v42 = vld [vmem:[%s1142_s3] ss:$0 sm:$0xff] (!%p262_p3)  ;;  %vm634_vm5 = vcmask (!%p262_p3), 253952  }
  0x10   : > { %s1157_s22 = smov (!%p323_p5, %s979_s22), 1  ;;  %s1159_s10 = smov (!%p335_p7, %s332_s10), 16 }
  0x11   : > { %s326_s8 = scalar_select %p325_p6, %s975_s21, 16 }
  0x12   : > { %s905_s9 = smul.u32 51, %s1157_s22  ;;  %s1161_s21 = smov (!%p345_p8, %s975_s21), 15 }
  0x13   : > { %s904_s11 = smul.u32 3, %s326_s8 }
  0x14   : > { %s906_s19 = smul.u32 3, %s1159_s10 }
  0x15   : > { %s329_s14 = sadd.s32 %s905_s9, %s904_s11  ;;  %s854_s11 = sshll.u32 %s1157_s22, 5 }
  0x16   : > { %s851_s15 = sshll.u32 %s329_s14, 2  ;;  %s339_s29 = sadd.s32 %s906_s19, %s905_s9 }
  0x17   : > { %s331_s18 = scalar_lea.vmem %s1139_s0, %s851_s15  ;;  %s852_s30 = sshll.u32 %s339_s29, 2 }
  0x18   : > { %v949_v7 = vld [vmem:[%s331_s18] sm:$0xff]   ;;  %v950_v8 = vld [vmem:[%s331_s18 + $0x8] ss:$0 sps:$4 sm:$0x11]   ;;  %s341_s10 = scalar_lea.vmem %s1140_s1, %s852_s30  ;;  %s853_s9 = sshll.u32 %s1161_s21, 1 }
  0x19   : > { %889 = vmatmul.mubr.msk.bf16.vlgmr.msra.gmra.mrb[0].mxu1 %vm394_vm2, %v949_v7  ;;  %v383_v9 = vshrl.u32 %v949_v7, 16  ;;  %v385_v10 = vshll.u32 %v949_v7, 16  ;;  %v390_v11 = vshll.u32 %v950_v8, 16  ;;  %v951_v18 = vld [vmem:[%s341_s10] sm:$0xff]   ;;  %s349_s12 = sadd.s32 %s854_s11, %s853_s9  ;;  %s856_s19 = sshll.u32 %s1157_s22, 4 }
  0x1a   : > { %899 = vmatpush3.bf16.msra.mxu1 %v568_v6  ;;  %900 = vmatprep.mubr.msk.bf16.mxu1 %vm994_vm1, %v993_v2  ;;  %v952_v19 = vld [vmem:[%s341_s10 + $0x8] ss:$0 sps:$4 sm:$0x11]   ;;  %v553_v20 = vshrl.u32 %v951_v18, 16  ;;  %v555_v21 = vshll.u32 %v951_v18, 16  ;;  %s855_s13 = sshll.u32 %s349_s12, 3  ;;  %s357_s20 = sadd.s32 %s856_s19, %s1161_s21 }
  0x1b   : > { %v387_v13 = vrot.slane %v385_v10, 1  ;;  %v392_v14 = vrot.slane %v390_v11, 1  ;;  %v560_v22 = vshll.u32 %v952_v19, 16  ;;  %s351_s18 = scalar_lea.vmem %s1143_s4, %s855_s13  ;;  %s358_s30 = scalar_lea.vmem %s1144_s5, %s357_s20 }
  0x1c   : > { %v557_v23 = vrot.slane %v555_v21, 1  ;;  %s365_s10 = scalar_lea.vmem %s1145_s6, %s357_s20 }
  0x1d   : > { %v388_v15 = vor.u32 %v387_v13, %v383_v9  ;;  %v562_v24 = vrot.slane %v560_v22, 1 }
  0x1e   : > { %v558_v25 = vor.u32 %v557_v23, %v553_v20 }
  0x1f   : > { %v393_v17 = vsel %vm381_vm3, %v388_v15, %v392_v14 }
  0x20   : > { %883 = vmatmul.mubr.msk.bf16.vlgmr.msra.gmra.mrb[0].mxu0 %vm394_vm2, %v393_v17  ;;  %v563_v26 = vsel %vm381_vm3, %v558_v25, %v562_v24 }
  0x21   : > { %893 = vmatpush3.bf16.msra.mxu0 %v503_v16  ;;  %894 = vmatprep.mubr.msk.bf16.mxu0 %vm994_vm1, %v993_v2 }
  0x22   : > { %901 = vmatmul.mubr.msk.bf16.vlgmr.msra.gmra.mrb[4].mxu1 %vm394_vm2, %v563_v26 }
  0x28   : > { %895 = vmatmul.mubr.msk.bf16.vlgmr.msra.gmra.mrb[4].mxu0 %vm394_vm2, %v951_v18 }
  0xec   : > { %v482_v27 = vpop.f32.mrb[0].mxu1 }
  0xed   : > { %v890_v28 = vpop.f32.mrb[1].mxu1 }
  0xee   : > { %v485_v29 = vpop.f32.mrb[2].mxu1 }
  0xef   : > { %v891_v30 = vpop.f32.mrb[3].mxu1 }
  0xf3   : > { %v436_v31 = vpop.f32.mrb[0].mxu0 }
  0xf4   : > { %v483_v32 = vadd.f32 %v482_v27, %v436_v31  ;;  %v884_v33 = vpop.f32.mrb[1].mxu0 }
  0xf5   : > { %v439_v34 = vpop.f32.mrb[2].mxu0  ;;  %v604_v37 = vpop.f32.mrb[4].mxu1 }
  0xf6   : > { %v486_v35 = vadd.f32 %v485_v29, %v439_v34  ;;  %v885_v36 = vpop.f32.mrb[3].mxu0  ;;  %v902_v40 = vpop.f32.mrb[5].mxu1 }
  0xf7   : > { %v607_v43 = vpop.f32.mrb[6].mxu1 }
  0xf8   : > { %v903_v47 = vpop.f32.mrb[7].mxu1 }
  0xfb   : > { %v539_v38 = vpop.f32.mrb[4].mxu0 }
  0xfc   : > { %v546_v39 = vadd.f32 %v539_v38, %v483_v32  ;;  %v896_v41 = vpop.f32.mrb[5].mxu0 }
  0xfd   : > { %v542_v44 = vpop.f32.mrb[6].mxu0 }
  0xfe   : > { %v611_v45 = vadd.f32 %v604_v37, %v546_v39  ;;  %v547_v46 = vadd.f32 %v542_v44, %v486_v35  ;;  %v897_v48 = vpop.f32.mrb[7].mxu0 }
 0x100   : > { %v620_v49 = vadd.f32 %v869_v42, %v611_v45  ;;  %v612_v50 = vadd.f32 %v607_v43, %v547_v46 }
 0x102   : > { %623 = vst.msk [vmem:[%s351_s18] sm:$0xff] %vm622_vm4, %v620_v49  ;;  %v636_v51 = vmul.f32 %v620_v49, %v620_v49  ;;  %v621_v52 = vadd.f32 %v869_v42, %v612_v50  ;;  %v625_v53 = vsel %vm622_vm4, %v620_v49, 0.0 }
 0x104   : > { %624 = vst.msk [vmem:[%s351_s18 + $0x8] sm:$0xff] %vm622_vm4, %v621_v52  ;;  %v626_v54 = vsel %vm622_vm4, %v621_v52, 0.0  ;;  %v637_v55 = vmul.f32 %v621_v52, %v621_v52  ;;  %v638_v57 = vsel %vm622_vm4, %v636_v51, 0.0 }
 0x105   : > { %v627_v56 = vadd.f32 %v626_v54, %v625_v53 }
 0x106   : > { %v639_v58 = vsel %vm622_vm4, %v637_v55, 0.0 }
 0x107   : > { %v628_v59 = vrot.slane %v627_v56, 4  ;;  %v640_v60 = vadd.f32 %v639_v58, %v638_v57 }
 0x109   : > { %v629_v61 = vadd.f32 %v628_v59, %v627_v56  ;;  %v641_v62 = vrot.slane %v640_v60, 4 }
 0x10b   : > { %v630_v63 = vrot.slane %v629_v61, 2  ;;  %v642_v0 = vadd.f32 %v641_v62, %v640_v60 }
 0x10d   : > { %v631_v1 = vadd.f32 %v630_v63, %v629_v61  ;;  %v643_v2 = vrot.slane %v642_v0, 2 }
 0x10f   : > { %v632_v3 = vrot.slane %v631_v1, 1  ;;  %v644_v4 = vadd.f32 %v643_v2, %v642_v0 }
 0x111   : > { %v633_v5 = vadd.f32 %v632_v3, %v631_v1  ;;  %v645_v6 = vrot.slane %v644_v4, 1 }
 0x113   : > { %635 = vst.msk [vmem:[%s358_s30] sm:$0x1] %vm634_vm5, %v633_v5  ;;  %v646_v7 = vadd.f32 %v645_v6, %v644_v4 }
 0x115   : > { %647 = vst.msk [vmem:[%s365_s10] sm:$0x1] %vm634_vm5, %v646_v7 }
 0x116 PF: > { %s17_s25 = sadd.s32 1, %s991_s25   ;;  %s1146_s21 = smov %s983_s23 }
 0x117   : > { %p14_p9 = scmp.ge.s32.totalorder %s17_s25, 34   ;;  %s1147_s22 = smov %s987_s24 }
 0x118   : > { %s1148_s23 = smov %s1151_s26  ;;  %s1149_s24 = smov %s1155_s27 }
 0x119   :  { %16 = sbr.rel (!%p14_p9) target bundleno = 3 (0x3), region = 96 }

// kernel: deconv_res_block.7
= control target key start
LH: loop header
LB: loop body
LE: loop exit
PB: predicated region body
PF: predicated region fallthrough
CT: control target
= control target key end

     0   :  { %s341_s0 = inlined_call_operand.vmem [shape: f32[128,128], index: 0, kind: input, shape index: {}]   ;;  %s342_s1 = inlined_call_operand.vmem [shape: f32[1,128], index: 1, kind: input, shape index: {}]   ;;  %s343_s2 = inlined_call_operand.vmem [shape: f32[1,128], index: 2, kind: input, shape index: {}]   ;;  %s344_s3 = inlined_call_operand.vmem [shape: f32[1,128], index: 3, kind: input, shape index: {}]   ;;  %s345_s4 = inlined_call_operand.vmem [shape: f32[128,128], index: 4, kind: output, shape index: {}]  }
   0x1   :  { %v17_v0 = vld [vmem:[%s341_s0] sm:$0xff]  ;;  %v18_v5 = vld [vmem:[%s341_s0 + $0x8] sm:$0xff]  ;;  %v19_v6 = vld [vmem:[%s341_s0 + $0x10] sm:$0xff] }
   0x2   :  { %v188_v1 = vld [vmem:[%s342_s1] ss:$0 sm:$0xff]  ;;  %v20_v9 = vld [vmem:[%s341_s0 + $0x18] sm:$0xff]  ;;  %v22_v11 = vld [vmem:[%s341_s0 + $0x28] sm:$0xff] }
   0x3   :  { %v193_v2 = vld [vmem:[%s343_s2] ss:$0 sm:$0xff]  ;;  %v40_v3 = vmul.f32 %v188_v1, %v17_v0  ;;  %v41_v7 = vmul.f32 %v188_v1, %v18_v5  ;;  %v42_v8 = vmul.f32 %v188_v1, %v19_v6  ;;  %v43_v13 = vmul.f32 %v188_v1, %v20_v9  ;;  %v23_v16 = vld [vmem:[%s341_s0 + $0x30] sm:$0xff]  ;;  %v24_v17 = vld [vmem:[%s341_s0 + $0x38] sm:$0xff] }
   0x4   :  { %v199_v4 = vld [vmem:[%s344_s3] ss:$0 sm:$0xff]  ;;  %v45_v15 = vmul.f32 %v188_v1, %v22_v11  ;;  %v46_v20 = vmul.f32 %v188_v1, %v23_v16  ;;  %v47_v21 = vmul.f32 %v188_v1, %v24_v17  ;;  %v26_v30 = vld [vmem:[%s341_s0 + $0x48] sm:$0xff]  ;;  %v27_v39 = vld [vmem:[%s341_s0 + $0x50] sm:$0xff] }
   0x5   :  { %v21_v10 = vld [vmem:[%s341_s0 + $0x20] sm:$0xff]  ;;  %v63_v12 = vadd.f32 %v193_v2, %v40_v3  ;;  %v64_v18 = vadd.f32 %v193_v2, %v41_v7  ;;  %v65_v19 = vadd.f32 %v193_v2, %v42_v8  ;;  %v66_v23 = vadd.f32 %v193_v2, %v43_v13  ;;  %v28_v43 = vld [vmem:[%s341_s0 + $0x58] sm:$0xff]  ;;  %v30_v51 = vld [vmem:[%s341_s0 + $0x68] sm:$0xff] }
   0x6   :  { %v44_v14 = vmul.f32 %v188_v1, %v21_v10  ;;  %v25_v27 = vld [vmem:[%s341_s0 + $0x40] sm:$0xff]  ;;  %v68_v34 = vadd.f32 %v193_v2, %v45_v15  ;;  %v69_v36 = vadd.f32 %v193_v2, %v46_v20  ;;  %v70_v37 = vadd.f32 %v193_v2, %v47_v21  ;;  %v31_v56 = vld [vmem:[%s341_s0 + $0x70] sm:$0xff]  ;;  %v32_v57 = vld [vmem:[%s341_s0 + $0x78] sm:$0xff] }
   0x7   :  { %vm79_vm0 = vcmp.ge.f32.partialorder %v63_v12, 0.0  ;;  %v102_v22 = vmul.f32 %v199_v4, %v63_v12  ;;  %vm80_vm1 = vcmp.ge.f32.partialorder %v64_v18, 0.0  ;;  %v103_v25 = vmul.f32 %v199_v4, %v64_v18  ;;  %v29_v44 = vld [vmem:[%s341_s0 + $0x60] sm:$0xff] }
   0x8   :  { %v67_v24 = vadd.f32 %v193_v2, %v44_v14  ;;  %vm81_vm2 = vcmp.ge.f32.partialorder %v65_v19, 0.0  ;;  %v104_v26 = vmul.f32 %v199_v4, %v65_v19  ;;  %vm82_vm3 = vcmp.ge.f32.partialorder %v66_v23, 0.0 }
   0x9   :  { %v118_v28 = vsel %vm79_vm0, %v63_v12, %v102_v22  ;;  %v105_v29 = vmul.f32 %v199_v4, %v66_v23  ;;  %v119_v31 = vsel %vm80_vm1, %v64_v18, %v103_v25  ;;  %v48_v38 = vmul.f32 %v188_v1, %v25_v27 }
   0xa   :  { %vm83_vm4 = vcmp.ge.f32.partialorder %v67_v24, 0.0  ;;  %134 = vst [vmem:[%s345_s4] sm:$0xff] %v118_v28  ;;  %v120_v32 = vsel %vm81_vm2, %v65_v19, %v104_v26  ;;  %v106_v33 = vmul.f32 %v199_v4, %v67_v24  ;;  %135 = vst [vmem:[%s345_s4 + $0x8] sm:$0xff] %v119_v31  ;;  %vm84_vm5 = vcmp.ge.f32.partialorder %v68_v34, 0.0 }
   0xb   :  { %136 = vst [vmem:[%s345_s4 + $0x10] sm:$0xff] %v120_v32  ;;  %v121_v35 = vsel %vm82_vm3, %v66_v23, %v105_v29  ;;  %v107_v41 = vmul.f32 %v199_v4, %v68_v34  ;;  %v49_v42 = vmul.f32 %v188_v1, %v26_v30  ;;  %vm85_vm6 = vcmp.ge.f32.partialorder %v69_v36, 0.0 }
   0xc   :  { %137 = vst [vmem:[%s345_s4 + $0x18] sm:$0xff] %v121_v35  ;;  %v122_v40 = vsel %vm83_vm4, %v67_v24, %v106_v33  ;;  %v108_v45 = vmul.f32 %v199_v4, %v69_v36  ;;  %vm86_vm7 = vcmp.ge.f32.partialorder %v70_v37, 0.0  ;;  %v109_v46 = vmul.f32 %v199_v4, %v70_v37 }
   0xd   :  { %138 = vst [vmem:[%s345_s4 + $0x20] sm:$0xff] %v122_v40  ;;  %v123_v47 = vsel %vm84_vm5, %v68_v34, %v107_v41  ;;  %v71_v48 = vadd.f32 %v193_v2, %v48_v38  ;;  %v72_v49 = vadd.f32 %v193_v2, %v49_v42  ;;  %v50_v50 = vmul.f32 %v188_v1, %v27_v39 }
   0xe   :  { %139 = vst [vmem:[%s345_s4 + $0x28] sm:$0xff] %v123_v47  ;;  %v124_v52 = vsel %vm85_vm6, %v69_v36, %v108_v45  ;;  %v125_v53 = vsel %vm86_vm7, %v70_v37, %v109_v46  ;;  %v51_v54 = vmul.f32 %v188_v1, %v28_v43  ;;  %v52_v55 = vmul.f32 %v188_v1, %v29_v44 }
   0xf   :  { %140 = vst [vmem:[%s345_s4 + $0x30] sm:$0xff] %v124_v52  ;;  %141 = vst [vmem:[%s345_s4 + $0x38] sm:$0xff] %v125_v53  ;;  %vm87_vm8 = vcmp.ge.f32.partialorder %v71_v48, 0.0  ;;  %v110_v58 = vmul.f32 %v199_v4, %v71_v48  ;;  %vm88_vm9 = vcmp.ge.f32.partialorder %v72_v49, 0.0  ;;  %v111_v59 = vmul.f32 %v199_v4, %v72_v49 }
  0x10   :  { %v73_v60 = vadd.f32 %v193_v2, %v50_v50  ;;  %v74_v61 = vadd.f32 %v193_v2, %v51_v54  ;;  %v75_v62 = vadd.f32 %v193_v2, %v52_v55  ;;  %v53_v63 = vmul.f32 %v188_v1, %v30_v51 }
  0x11   :  { %v126_v0 = vsel %vm87_vm8, %v71_v48, %v110_v58  ;;  %v127_v3 = vsel %vm88_vm9, %v72_v49, %v111_v59  ;;  %v54_v5 = vmul.f32 %v188_v1, %v31_v56  ;;  %v55_v6 = vmul.f32 %v188_v1, %v32_v57 }
  0x12   :  { %142 = vst [vmem:[%s345_s4 + $0x40] sm:$0xff] %v126_v0  ;;  %143 = vst [vmem:[%s345_s4 + $0x48] sm:$0xff] %v127_v3  ;;  %vm89_vm10 = vcmp.ge.f32.partialorder %v73_v60, 0.0  ;;  %v112_v7 = vmul.f32 %v199_v4, %v73_v60  ;;  %vm90_vm11 = vcmp.ge.f32.partialorder %v74_v61, 0.0  ;;  %v113_v8 = vmul.f32 %v199_v4, %v74_v61 }
  0x13   :  { %vm91_vm12 = vcmp.ge.f32.partialorder %v75_v62, 0.0  ;;  %v114_v9 = vmul.f32 %v199_v4, %v75_v62  ;;  %v76_v10 = vadd.f32 %v193_v2, %v53_v63  ;;  %v77_v1 = vadd.f32 %v193_v2, %v54_v5 }
  0x14   :  { %v128_v11 = vsel %vm89_vm10, %v73_v60, %v112_v7  ;;  %v129_v12 = vsel %vm90_vm11, %v74_v61, %v113_v8  ;;  %v78_v13 = vadd.f32 %v193_v2, %v55_v6 }
  0x15   :  { %144 = vst [vmem:[%s345_s4 + $0x50] sm:$0xff] %v128_v11  ;;  %145 = vst [vmem:[%s345_s4 + $0x58] sm:$0xff] %v129_v12  ;;  %v130_v14 = vsel %vm91_vm12, %v75_v62, %v114_v9  ;;  %vm92_vm13 = vcmp.ge.f32.partialorder %v76_v10, 0.0  ;;  %v115_v15 = vmul.f32 %v199_v4, %v76_v10  ;;  %vm93_vm14 = vcmp.ge.f32.partialorder %v77_v1, 0.0 }
  0x16   :  { %146 = vst [vmem:[%s345_s4 + $0x60] sm:$0xff] %v130_v14  ;;  %v116_v16 = vmul.f32 %v199_v4, %v77_v1  ;;  %vm94_vm15 = vcmp.ge.f32.partialorder %v78_v13, 0.0  ;;  %v117_v2 = vmul.f32 %v199_v4, %v78_v13 }
  0x17   :  { %v131_v17 = vsel %vm92_vm13, %v76_v10, %v115_v15 }
  0x18   :  { %147 = vst [vmem:[%s345_s4 + $0x68] sm:$0xff] %v131_v17  ;;  %v132_v18 = vsel %vm93_vm14, %v77_v1, %v116_v16  ;;  %v133_v19 = vsel %vm94_vm15, %v78_v13, %v117_v2 }
  0x19   :  { %148 = vst [vmem:[%s345_s4 + $0x70] sm:$0xff] %v132_v18  ;;  %149 = vst [vmem:[%s345_s4 + $0x78] sm:$0xff] %v133_v19 }

// kernel: tile.59
= control target key start
LH: loop header
LB: loop body
LE: loop exit
PB: predicated region body
PF: predicated region fallthrough
CT: control target
= control target key end

     0   :  { %s28_s0 = inlined_call_operand.vmem [shape: f32[8], index: 0, kind: input, shape index: {}]   ;;  %s29_s1 = inlined_call_operand.vmem [shape: f32[16,8], index: 1, kind: output, shape index: {}]  }
   0x1   :  { %v4_v0 = vld [vmem:[%s28_s0] ss:$0 sm:$0xff] }
   0x2   :  { %5 = vst [vmem:[%s29_s1] sm:$0xff] %v4_v0  ;;  %8 = vst [vmem:[%s29_s1 + $0x8] sm:$0xff] %v4_v0 }

// kernel: tile.60
= control target key start
LH: loop header
LB: loop body
LE: loop exit
PB: predicated region body
PF: predicated region fallthrough
CT: control target
= control target key end

     0   :  { %s131_s10 = smov 120   ;;  %s132_s11 = smov 104   ;;  %vm3_vm0 = vcmask 64512   ;;  %vm9_vm1 = vcmask 1048512   ;;  %vm15_vm2 = vcmask 982912   ;;  %vm21_vm3 = vcmask 917312   ;;  %s207_s0 = inlined_call_operand.vmem [shape: f32[16,8], index: 0, kind: input, shape index: {}]   ;;  %s208_s1 = inlined_call_operand.vmem [shape: f32[1,128], index: 1, kind: output, shape index: {}]  }
   0x1   :  { %v101_v0 = vld [vmem:[%s207_s0 + $0xf] sm:$0x1]   ;;  %v103_v1 = vld [vmem:[%s207_s0 + $0xd] sm:$0x1]   ;;  %v102_v2 = vld [vmem:[%s207_s0 + $0xe] sm:$0x1]  }
   0x2   :  { %7 = vrot.lane.b32.xlu0 %v101_v0, %s131_s10  ;;  %19 = vrot.lane.b32.xlu1 %v103_v1, %s132_s11  ;;  %v104_v3 = vld [vmem:[%s207_s0 + $0xc] sm:$0x1]   ;;  %s133_s16 = smov 112   ;;  %s134_s17 = smov 96   ;;  %v105_v4 = vld [vmem:[%s207_s0 + $0xb] sm:$0x1]  }
   0x3   :  { %v106_v5 = vld [vmem:[%s207_s0 + $0xa] sm:$0x1]   ;;  %v2_v6 = vld [vmem:[%s207_s0] sm:$0x1]   ;;  %s135_s24 = smov 88   ;;  %s136_s25 = smov 80  }
   0x4   :  { %4 = vst.msk [vmem:[#allocation0] sm:$0x1] %vm3_vm0, %v2_v6   ;;  %v107_v7 = vld [vmem:[%s207_s0 + $0x9] sm:$0x1]   ;;  %v108_v8 = vld [vmem:[%s207_s0 + $0x8] sm:$0x1]  }
   0x5   :  { %s137_s30 = smov 72   ;;  %s138_s2 = smov 64   ;;  %v109_v9 = vld [vmem:[%s207_s0 + $0x7] sm:$0x1]   ;;  %v110_v10 = vld [vmem:[%s207_s0 + $0x6] sm:$0x1]  }
   0x6   :  { %13 = vrot.lane.b32.xlu0 %v102_v2, %s133_s16  ;;  %25 = vrot.lane.b32.xlu1 %v104_v3, %s134_s17  ;;  %s139_s7 = smov 56   ;;  %s140_s8 = smov 48   ;;  %v111_v11 = vld [vmem:[%s207_s0 + $0x5] sm:$0x1]   ;;  %v112_v12 = vld [vmem:[%s207_s0 + $0x4] sm:$0x1]  }
   0x7   :  { %s141_s13 = smov 40   ;;  %s142_s14 = smov 32   ;;  %v113_v13 = vld [vmem:[%s207_s0 + $0x3] sm:$0x1]   ;;  %v114_v14 = vld [vmem:[%s207_s0 + $0x2] sm:$0x1]  }
   0x8   :  { %s143_s19 = smov 24   ;;  %s144_s20 = smov 16   ;;  %v115_v15 = vld [vmem:[%s207_s0 + $0x1] sm:$0x1]   ;;  %vm27_vm4 = vcmask 851712   ;;  %vm33_vm5 = vcmask 786112  }
   0x9   :  { %s145_s0 = smov 8   ;;  %vm39_vm6 = vcmask 720512   ;;  %vm45_vm7 = vcmask 654912   ;;  %vm51_vm8 = vcmask 589312   ;;  %vm57_vm9 = vcmask 523712  }
   0xa   :  { %31 = vrot.lane.b32.xlu0 %v105_v4, %s135_s24  ;;  %37 = vrot.lane.b32.xlu1 %v106_v5, %s136_s25  ;;  %vm63_vm10 = vcmask 458112   ;;  %vm69_vm11 = vcmask 392512   ;;  %vm75_vm12 = vcmask 326912   ;;  %vm81_vm13 = vcmask 261312  }
   0xb   :  { %vm87_vm14 = vcmask 195712   ;;  %vm93_vm15 = vcmask 130112  }
   0xe   :  { %43 = vrot.lane.b32.xlu0 %v107_v7, %s137_s30  ;;  %49 = vrot.lane.b32.xlu1 %v108_v8, %s138_s2 }
  0x12   :  { %55 = vrot.lane.b32.xlu0 %v109_v9, %s139_s7  ;;  %61 = vrot.lane.b32.xlu1 %v110_v10, %s140_s8 }
  0x16   :  { %67 = vrot.lane.b32.xlu0 %v111_v11, %s141_s13  ;;  %73 = vrot.lane.b32.xlu1 %v112_v12, %s142_s14 }
  0x1a   :  { %79 = vrot.lane.b32.xlu0 %v113_v13, %s143_s19  ;;  %85 = vrot.lane.b32.xlu1 %v114_v14, %s144_s20 }
  0x1e   :  { %91 = vrot.lane.b32.xlu0 %v115_v15, %s145_s0 }
  0x74   :  { %v8_v16 = vpop.permute.xlu0 %7   ;;  %v20_v17 = vpop.permute.xlu1 %19  }
  0x75   :  { %10 = vst.msk [vmem:[#allocation0] sm:$0x1] %vm9_vm1, %v8_v16  }
  0x78   :  { %v14_v18 = vpop.permute.xlu0 %13   ;;  %v26_v19 = vpop.permute.xlu1 %25  }
  0x79   :  { %16 = vst.msk [vmem:[#allocation0] sm:$0x1] %vm15_vm2, %v14_v18  }
  0x7a   :  { %22 = vst.msk [vmem:[#allocation0] sm:$0x1] %vm21_vm3, %v20_v17  }
  0x7b   :  { %28 = vst.msk [vmem:[#allocation0] sm:$0x1] %vm27_vm4, %v26_v19  }
  0x7c   :  { %v32_v20 = vpop.permute.xlu0 %31   ;;  %v38_v21 = vpop.permute.xlu1 %37  }
  0x7d   :  { %34 = vst.msk [vmem:[#allocation0] sm:$0x1] %vm33_vm5, %v32_v20  }
  0x7e   :  { %40 = vst.msk [vmem:[#allocation0] sm:$0x1] %vm39_vm6, %v38_v21  }
  0x80   :  { %v44_v22 = vpop.permute.xlu0 %43   ;;  %v50_v23 = vpop.permute.xlu1 %49  }
  0x81   :  { %46 = vst.msk [vmem:[#allocation0] sm:$0x1] %vm45_vm7, %v44_v22  }
  0x82   :  { %52 = vst.msk [vmem:[#allocation0] sm:$0x1] %vm51_vm8, %v50_v23  }
  0x84   :  { %v56_v24 = vpop.permute.xlu0 %55   ;;  %v62_v25 = vpop.permute.xlu1 %61  }
  0x85   :  { %58 = vst.msk [vmem:[#allocation0] sm:$0x1] %vm57_vm9, %v56_v24  }
  0x86   :  { %64 = vst.msk [vmem:[#allocation0] sm:$0x1] %vm63_vm10, %v62_v25  }
  0x88   :  { %v68_v26 = vpop.permute.xlu0 %67   ;;  %v74_v27 = vpop.permute.xlu1 %73  }
  0x89   :  { %70 = vst.msk [vmem:[#allocation0] sm:$0x1] %vm69_vm11, %v68_v26  }
  0x8a   :  { %76 = vst.msk [vmem:[#allocation0] sm:$0x1] %vm75_vm12, %v74_v27  }
  0x8c   :  { %v80_v28 = vpop.permute.xlu0 %79   ;;  %v86_v29 = vpop.permute.xlu1 %85  }
  0x8d   :  { %82 = vst.msk [vmem:[#allocation0] sm:$0x1] %vm81_vm13, %v80_v28  }
  0x8e   :  { %88 = vst.msk [vmem:[#allocation0] sm:$0x1] %vm87_vm14, %v86_v29  }
  0x90   :  { %v92_v30 = vpop.permute.xlu0 %91  }
  0x91   :  { %94 = vst.msk [vmem:[#allocation0] sm:$0x1] %vm93_vm15, %v92_v30  }
  0x98   :  { %v98_v31 = vld [vmem:[#allocation0] sm:$0x1] }
  0x99   :  { %100 = vst [vmem:[%s208_s1] sm:$0x1] %v98_v31 }

// kernel: deconv_res_block.8
= control target key start
LH: loop header
LB: loop body
LE: loop exit
PB: predicated region body
PF: predicated region fallthrough
CT: control target
= control target key end

     0   :  { %s1702_s24 = smov 0   ;;  %s1704_s25 = smov 0   ;;  %s1903_s0 = inlined_call_operand.vmem [shape: bf16[2,34,34,8], index: 0, kind: input, shape index: {}, may-alias: {0,1,2}]   ;;  %s1904_s1 = inlined_call_operand.vmem [shape: bf16[2,34,34,8], index: 1, kind: input, shape index: {}, may-alias: {0,1,2}]   ;;  %s1905_s2 = inlined_call_operand.vmem [shape: bf16[2,34,34,8], index: 2, kind: input, shape index: {}, may-alias: {0,1,2}]   ;;  %s1906_s3 = inlined_call_operand.vmem [shape: bf16[9,8,8], index: 3, kind: input, shape index: {}]   ;;  %s1907_s4 = inlined_call_operand.vmem [shape: f32[1,8], index: 4, kind: input, shape index: {}]   ;;  %s1908_s5 = inlined_call_operand.vmem [shape: f32[2,32,32,8], index: 5, kind: output, shape index: {0}]   ;;  %s1909_s6 = inlined_call_operand.vmem [shape: f32[2,32,1,8], index: 6, kind: output, shape index: {1}]   ;;  %s1910_s7 = inlined_call_operand.vmem [shape: f32[2,32,1,8], index: 7, kind: output, shape index: {2}]  }
   0x1   :  { %s1706_s26 = smov 0   ;;  %s1708_s27 = smov 0  }
   0x2   :  { %s1710_s28 = smov 0  }
   0x3 LB: > { %s27_s29 = sadd.s32 1, %s1652_s26  ;;  %s30_s30 = sadd.s32 1, %s1656_s27  ;;  %s1660_s28 = sphi %s1710_s28, %s18_s28   ;;  %s1656_s27 = sphi %s1708_s27, %s1914_s27   ;;  %s1652_s26 = sphi %s1706_s26, %s1913_s26   ;;  %s1648_s25 = sphi %s1704_s25, %s1912_s25   ;;  %s1644_s24 = sphi %s1702_s24, %s1911_s24  }
   0x4   : > { %p28_p0 = scmp.ge.s32.totalorder %s27_s29, 32  ;;  %p1400_p1 = scmp.ge.s32.totalorder %s1660_s28, 1 }
   0x5   : > { %p306_p2 = scmp.lt.s32.totalorder %s1660_s28, 65 }
   0x6   : > { %s1916_s29 = smov (%p28_p0, %s27_s29), 0  ;;  %s1918_s30 = smov (!%p28_p0, %s30_s30), %s1656_s27 }
   0x7   : > { %p307_p3 = pnand %p1400_p1, %p306_p2  ;;  %p32_p4 = scmp.ge.s32.totalorder %s1918_s30, 2 }
   0x8   : > { %v1409_v0 = vld [vmem:[%s1906_s3 + $0x4] sm:$0xf] (!%p307_p3)  ;;  %vm484_vm0 = vcmask (!%p307_p3), 1043456   ;;  %v1425_v1 = vld [vmem:[%s1906_s3 + $0x10] sm:$0xf] (!%p307_p3)  ;;  %p380_p5 = scmp.lt.s32.totalorder (!%p307_p3), %s1648_s25, 1 }
   0x9   : > { %s1920_s30 = smov (%p32_p4, %s1918_s30), 0  ;;  %310 = sbr.rel (%p307_p3) target bundleno = 325 (0x145), region = 40 }
   0xa   : > { %1560 = vmatprep.subr.msk.bf16.mxu1 (!%p307_p3), %vm484_vm0, %v1409_v0  ;;  %1564 = vmatprep.subr.msk.bf16.mxu0 (!%p307_p3), %vm484_vm0, %v1425_v1  ;;  %v486_v2 = vsel (!%p307_p3), %vm484_vm0, %v1409_v0, 0  ;;  %v772_v3 = vsel (!%p307_p3), %vm484_vm0, %v1425_v1, 0  ;;  %p382_p6 = scmp.lt.s32.totalorder (!%p307_p3), %s1644_s24, 33  ;;  %v1750_v4 = vld [vmem:[%s1906_s3 + $0x14] sm:$0xf] (!%p307_p3)  ;;  %s389_s18 = sadd.s32 (!%p307_p3), 1, %s1644_s24 }
   0xb   : > { %1475 = vmatpush3.bf16.msra.mxu1 (!%p307_p3), %v486_v2  ;;  %1499 = vmatpush3.bf16.msra.mxu0 (!%p307_p3), %v772_v3  ;;  %v440_v5 = vld [vmem:[%s1906_s3] sm:$0xf] (!%p307_p3)  ;;  %s400_s20 = sadd.s32 (!%p307_p3), 2, %s1644_s24  ;;  %p392_p7 = scmp.lt.s32.totalorder (!%p307_p3), %s389_s18, 33  ;;  %vm456_vm1 = vsmask.f32 (!%p307_p3), 7424 }
   0xc   : > { %1565 = vmatprep.subr.msk.bf16.mxu0 (!%p307_p3), %vm484_vm0, %v1750_v4  ;;  %1561 = vmatprep.subr.msk.bf16.mxu1 (!%p307_p3), %vm484_vm0, %v440_v5  ;;  %p403_p8 = scmp.lt.s32.totalorder (!%p307_p3), %s400_s20, 33  ;;  %vm477_vm2 = vcmask (!%p307_p3), 64512   ;;  %v1417_v19 = vld [vmem:[%s1906_s3 + $0x8] sm:$0xf] (!%p307_p3)  ;;  %v542_v24 = vsel (!%p307_p3), %vm484_vm0, %v440_v5, 0  ;;  %vm595_vm3 = vcmask (!%p307_p3), 1046528  }
   0xd   : > { %v841_v38 = vsel (!%p307_p3), %vm484_vm0, %v1750_v4, 0  ;;  %v1432_v44 = vld [vmem:[%s1906_s3 + $0x18] sm:$0xf] (!%p307_p3)  ;;  %v608_v45 = vsel (!%p307_p3), %vm484_vm0, %v1417_v19, 0  ;;  %v1420_v47 = vld [vmem:[%s1906_s3 + $0xc] sm:$0xf] (!%p307_p3) }
   0xe   : > { %v920_v52 = vsel (!%p307_p3), %vm484_vm0, %v1432_v44, 0  ;;  %v1437_v54 = vld [vmem:[%s1906_s3 + $0x1c] sm:$0xf] (!%p307_p3)  ;;  %v687_v57 = vsel (!%p307_p3), %vm484_vm0, %v1420_v47, 0  ;;  %v1441_v2 = vld [vmem:[%s1906_s3 + $0x20] sm:$0xf] (!%p307_p3) }
   0xf   : > { %v1005_v0 = vsel (!%p307_p3), %vm484_vm0, %v1437_v54, 0  ;;  %p413_p9 = scmp.lt.s32.totalorder (!%p307_p3), %s1644_s24, 31  ;;  %vm1157_vm4 = vcmask (!%p307_p3), 57344  }
  0x10   : > { %s1922_s25 = smov (!%p380_p5, %s1648_s25), 1  ;;  %s1924_s18 = smov (!%p392_p7, %s389_s18), 33 }
  0x11   : > { %s383_s16 = scalar_select %p382_p6, %s1644_s24, 33 }
  0x12   : > { %s1570_s17 = smul.u32 170, %s1922_s25  ;;  %s1926_s20 = smov (!%p403_p8, %s400_s20), 33 }
  0x13   : > { %s1569_s19 = smul.u32 5, %s383_s16  ;;  %s1928_s24 = smov (!%p413_p9, %s1644_s24), 31 }
  0x14   : > { %s1571_s10 = smul.u32 5, %s1924_s18  ;;  %s1404_s16 = sshll.u32 %s1928_s24, 2 }
  0x15   : > { %s386_s21 = sadd.s32 %s1570_s17, %s1569_s19  ;;  %s1572_s11 = smul.u32 5, %s1926_s20 }
  0x16   : > { %s1401_s22 = sshll.u32 %s386_s21, 2  ;;  %s396_s12 = sadd.s32 %s1571_s10, %s1570_s17 }
  0x17   : > { %s388_s9 = scalar_lea.vmem %s1903_s0, %s1401_s22  ;;  %s1402_s13 = sshll.u32 %s396_s12, 2 }
  0x18   : > { %v1765_v6 = vld [vmem:[%s388_s9] sm:$0xff]   ;;  %v1767_v7 = vld [vmem:[%s388_s9 + $0x8] sm:$0xff]   ;;  %v1769_v8 = vld [vmem:[%s388_s9 + $0x10] ss:$0 sps:$4 sm:$0x11]   ;;  %s407_s14 = sadd.s32 %s1572_s11, %s1570_s17  ;;  %s398_s19 = scalar_lea.vmem %s1904_s1, %s1402_s13 }
  0x19   : > { %v458_v9 = vshrl.u32 %v1765_v6, 16  ;;  %v460_v10 = vshll.u32 %v1765_v6, 16  ;;  %v465_v11 = vshll.u32 %v1767_v7, 16  ;;  %v469_v12 = vshrl.u32 %v1767_v7, 16  ;;  %s1403_s21 = sshll.u32 %s407_s14, 2  ;;  %v1616_v22 = vld [vmem:[%s398_s19] sm:$0xff]  }
  0x1a   : > { %v473_v13 = vshll.u32 %v1769_v8, 16  ;;  %v1784_v23 = vld [vmem:[%s398_s19 + $0x8] sm:$0xff]   ;;  %v1618_v25 = vld [vmem:[%s398_s19 + $0x10] ss:$0 sps:$4 sm:$0x11]   ;;  %s1791_s23 = scalar_lea.vmem %s1905_s2, %s1403_s21  ;;  %v747_v26 = vshrl.u32 %v1616_v22, 16 }
  0x1b   : > { %v462_v14 = vrot.slane %v460_v10, 1  ;;  %v467_v15 = vrot.slane %v465_v11, 1  ;;  %v749_v27 = vshll.u32 %v1616_v22, 16  ;;  %v753_v28 = vshll.u32 %v1784_v23, 16  ;;  %v1619_v49 = vld [vmem:[%s1791_s23] sm:$0xff]   ;;  %v1620_v55 = vld [vmem:[%s1791_s23 + $0x8] sm:$0xff]  }
  0x1c   : > { %v475_v16 = vrot.slane %v473_v13, 1  ;;  %v757_v29 = vshrl.u32 %v1784_v23, 16  ;;  %v761_v30 = vshll.u32 %v1618_v25, 16  ;;  %v829_v31 = vrot.slane %v1616_v22, 1  ;;  %s1405_s19 = sshll.u32 %s1922_s25, 7  ;;  %s1407_s9 = sshll.u32 %s1922_s25, 5 }
  0x1d   : > { %v463_v17 = vor.u32 %v462_v14, %v458_v9  ;;  %v471_v18 = vor.u32 %v469_v12, %v467_v15  ;;  %v830_v32 = vrot.slane %v1784_v23, 1  ;;  %v751_v33 = vrot.slane %v749_v27, 1  ;;  %v1621_v63 = vld [vmem:[%s1791_s23 + $0x10] ss:$0 sps:$4 sm:$0x11]   ;;  %s417_s21 = sadd.s32 %s1405_s19, %s1404_s16  ;;  %s425_s10 = sadd.s32 %s1407_s9, %s1928_s24 }
  0x1e   : > { %v755_v34 = vrot.slane %v753_v28, 1  ;;  %v763_v35 = vrot.slane %v761_v30, 1  ;;  %v596_v39 = vrot.slane %v1765_v6, 1  ;;  %v597_v43 = vrot.slane %v1767_v7, 1  ;;  %s1406_s22 = sshll.u32 %s417_s21, 3  ;;  %s426_s13 = scalar_lea.vmem %s1909_s6, %s425_s10 }
  0x1f   : > { %v468_v20 = vsel %vm456_vm1, %v463_v17, %v467_v15  ;;  %v476_v21 = vsel %vm456_vm1, %v471_v18, %v475_v16  ;;  %v752_v36 = vor.u32 %v751_v33, %v747_v26  ;;  %v831_v42 = vsel %vm595_vm3, %v829_v31, %v830_v32  ;;  %s419_s8 = scalar_lea.vmem %s1908_s5, %s1406_s22  ;;  %s433_s16 = scalar_lea.vmem %s1910_s7, %s425_s10 }
  0x20   : > { %1476 = vmatprep.mubr.msk.bf16.mxu1 %vm477_vm2, %v468_v20  ;;  %v759_v37 = vor.u32 %v757_v29, %v755_v34  ;;  %v598_v46 = vsel %vm595_vm3, %v596_v39, %v597_v43  ;;  %v832_v48 = vrot.slane %v1618_v25, 1  ;;  %v599_v51 = vrot.slane %v1769_v8, 1 }
  0x21   : > { %1477 = vmatmul.mubr.msk.bf16.vlgmr.msra.gmra.mrb[0].mxu1 %vm477_vm2, %v476_v21  ;;  %v756_v40 = vsel %vm456_vm1, %v752_v36, %v755_v34  ;;  %v982_v53 = vshll.u32 %v1619_v49, 16  ;;  %v980_v58 = vshrl.u32 %v1619_v49, 16  ;;  %v986_v60 = vshll.u32 %v1620_v55, 16 }
  0x22   : > { %1481 = vmatpush3.bf16.msra.mxu1 %v542_v24  ;;  %1482 = vmatprep.mubr.msk.bf16.mxu1 %vm477_vm2, %v1765_v6  ;;  %v764_v41 = vsel %vm456_vm1, %v759_v37, %v763_v35  ;;  %v833_v50 = vsel %vm595_vm3, %v830_v32, %v832_v48  ;;  %v600_v56 = vsel %vm595_vm3, %v597_v43, %v599_v51  ;;  %v990_v3 = vshrl.u32 %v1620_v55, 16 }
  0x23   : > { %1562 = vmatprep.subr.msk.bf16.mxu1 %vm484_vm0, %v1417_v19  ;;  %1500 = vmatprep.mubr.msk.bf16.mxu0 %vm477_vm2, %v756_v40  ;;  %v984_v59 = vrot.slane %v982_v53, 1  ;;  %v988_v62 = vrot.slane %v986_v60, 1  ;;  %v994_v4 = vshll.u32 %v1621_v63, 16  ;;  %v1063_v8 = vrot.slane %v1620_v55, 1  ;;  %v1444_v19 = vld [vmem:[%s1907_s4] ss:$0 sm:$0xff] }
  0x24   : > { %1501 = vmatmul.mubr.msk.bf16.vlgmr.msra.gmra.mrb[0].mxu0 %vm477_vm2, %v764_v41  ;;  %v1074_v10 = vsel %vm484_vm0, %v1441_v2, 0  ;;  %v1065_v12 = vrot.slane %v1621_v63, 1 }
  0x25   : > { %1505 = vmatpush3.bf16.msra.mxu0 %v841_v38  ;;  %1506 = vmatprep.mubr.msk.bf16.mxu0 %vm477_vm2, %v831_v42  ;;  %v985_v61 = vor.u32 %v984_v59, %v980_v58  ;;  %v992_v5 = vor.u32 %v990_v3, %v988_v62  ;;  %v996_v6 = vrot.slane %v994_v4, 1 }
  0x26   : > { %1566 = vmatprep.subr.msk.bf16.mxu0 %vm484_vm0, %v1432_v44  ;;  %v1066_v13 = vsel %vm595_vm3, %v1063_v8, %v1065_v12 }
  0x27   : > { %v989_v1 = vsel %vm456_vm1, %v985_v61, %v988_v62  ;;  %v997_v9 = vsel %vm456_vm1, %v992_v5, %v996_v6 }
  0x2d   : > { %1483 = vmatmul.mubr.msk.bf16.vlgmr.msra.gmra.mrb[0].mxu1 %vm477_vm2, %v1767_v7  ;;  %v1062_v7 = vrot.slane %v1619_v49, 1 }
  0x2e   : > { %1487 = vmatpush3.bf16.msra.mxu1 %v608_v45  ;;  %1488 = vmatprep.mubr.msk.bf16.mxu1 %vm477_vm2, %v598_v46 }
  0x2f   : > { %1563 = vmatprep.subr.msk.bf16.mxu1 %vm484_vm0, %v1420_v47  ;;  %v1064_v11 = vsel %vm595_vm3, %v1062_v7, %v1063_v8 }
  0x30   : > { %1507 = vmatmul.mubr.msk.bf16.vlgmr.msra.gmra.mrb[0].mxu0 %vm477_vm2, %v833_v50 }
  0x31   : > { %1511 = vmatpush3.bf16.msra.mxu0 %v920_v52  ;;  %1512 = vmatprep.mubr.msk.bf16.mxu0 %vm477_vm2, %v1619_v49 }
  0x32   : > { %1567 = vmatprep.subr.msk.bf16.mxu0 %vm484_vm0, %v1437_v54 }
  0x39   : > { %1489 = vmatmul.mubr.msk.bf16.vlgmr.msra.gmra.mrb[0].mxu1 %vm477_vm2, %v600_v56 }
  0x3a   : > { %1493 = vmatpush3.bf16.msra.mxu1 %v687_v57  ;;  %1494 = vmatprep.mubr.msk.bf16.mxu1 %vm477_vm2, %v1616_v22 }
  0x3c   : > { %1513 = vmatmul.mubr.msk.bf16.vlgmr.msra.gmra.mrb[0].mxu0 %vm477_vm2, %v1620_v55 }
  0x3d   : > { %1517 = vmatpush3.bf16.msra.mxu0 %v1005_v0  ;;  %1518 = vmatprep.mubr.msk.bf16.mxu0 %vm477_vm2, %v989_v1 }
  0x3e   : > { %1568 = vmatprep.subr.msk.bf16.mxu0 %vm484_vm0, %v1441_v2 }
  0x45   : > { %1495 = vmatmul.mubr.msk.bf16.vlgmr.msra.gmra.mrb[0].mxu1 %vm477_vm2, %v1784_v23 }
  0x48   : > { %1519 = vmatmul.mubr.msk.bf16.vlgmr.msra.gmra.mrb[0].mxu0 %vm477_vm2, %v997_v9 }
  0x49   : > { %1523 = vmatpush3.bf16.msra.mxu0 %v1074_v10  ;;  %1524 = vmatprep.mubr.msk.bf16.mxu0 %vm477_vm2, %v1064_v11 }
  0x54   : > { %1525 = vmatmul.mubr.msk.bf16.vlgmr.msra.gmra.mrb[0].mxu0 %vm477_vm2, %v1066_v13 }
 0x118   : > { %v1496_v14 = vpop.f32.mrb[0].mxu1 }
 0x119   : > { %v723_v15 = vpop.f32.mrb[1].mxu1 }
 0x11a   : > { %v1497_v16 = vpop.f32.mrb[2].mxu1 }
 0x11b   : > { %v726_v17 = vpop.f32.mrb[3].mxu1 }
 0x127   : > { %v1526_v18 = vpop.f32.mrb[0].mxu0 }
 0x128   : > { %v1528_v20 = vadd.f32 %v1526_v18, %v1496_v14  ;;  %v1110_v21 = vpop.f32.mrb[1].mxu0 }
 0x129   : > { %v1529_v22 = vadd.f32 %v1110_v21, %v723_v15  ;;  %v1527_v23 = vpop.f32.mrb[2].mxu0 }
 0x12a   : > { %v1138_v24 = vadd.f32 %v1528_v20, %v1444_v19  ;;  %v1530_v25 = vadd.f32 %v1527_v23, %v1497_v16  ;;  %v1113_v26 = vpop.f32.mrb[3].mxu0 }
 0x12b   : > { %v1136_v27 = vadd.f32 %v1529_v22, %v1444_v19  ;;  %v1531_v28 = vadd.f32 %v1113_v26, %v726_v17 }
 0x12c   : > { %1142 = vst.msk [vmem:[%s419_s8 + $0x10] sm:$0xff] %vm477_vm2, %v1138_v24  ;;  %v1139_v29 = vadd.f32 %v1530_v25, %v1444_v19  ;;  %v1161_v32 = vmul.f32 %v1138_v24, %v1138_v24  ;;  %v1147_v37 = vsel %vm477_vm2, %v1138_v24, 0.0 }
 0x12d   : > { %1140 = vst.msk [vmem:[%s419_s8] sm:$0xff] %vm477_vm2, %v1136_v27  ;;  %v1159_v30 = vmul.f32 %v1136_v27, %v1136_v27  ;;  %v1137_v31 = vadd.f32 %v1531_v28, %v1444_v19  ;;  %v1144_v33 = vsel %vm477_vm2, %v1136_v27, 0.0 }
 0x12e   : > { %1143 = vst.msk [vmem:[%s419_s8 + $0x18] sm:$0xff] %vm477_vm2, %v1139_v29  ;;  %v1162_v39 = vmul.f32 %v1139_v29, %v1139_v29  ;;  %v1166_v43 = vsel %vm477_vm2, %v1161_v32, 0.0  ;;  %v1149_v44 = vsel %vm477_vm2, %v1139_v29, 0.0 }
 0x12f   : > { %1141 = vst.msk [vmem:[%s419_s8 + $0x8] sm:$0xff] %vm477_vm2, %v1137_v31  ;;  %v1145_v34 = vsel %vm477_vm2, %v1137_v31, 0.0  ;;  %v1160_v35 = vmul.f32 %v1137_v31, %v1137_v31  ;;  %v1163_v38 = vsel %vm477_vm2, %v1159_v30, 0.0 }
 0x130   : > { %v1146_v36 = vadd.f32 %v1145_v34, %v1144_v33  ;;  %v1168_v47 = vsel %vm477_vm2, %v1162_v39, 0.0 }
 0x131   : > { %v1164_v40 = vsel %vm477_vm2, %v1160_v35, 0.0 }
 0x132   : > { %v1148_v41 = vadd.f32 %v1147_v37, %v1146_v36  ;;  %v1165_v42 = vadd.f32 %v1164_v40, %v1163_v38 }
 0x134   : > { %v1150_v45 = vadd.f32 %v1149_v44, %v1148_v41  ;;  %v1167_v46 = vadd.f32 %v1166_v43, %v1165_v42 }
 0x136   : > { %v1151_v48 = vrot.slane %v1150_v45, 4  ;;  %v1169_v49 = vadd.f32 %v1168_v47, %v1167_v46 }
 0x138   : > { %v1152_v50 = vadd.f32 %v1151_v48, %v1150_v45  ;;  %v1170_v51 = vrot.slane %v1169_v49, 4 }
 0x13a   : > { %v1153_v52 = vrot.slane %v1152_v50, 2  ;;  %v1171_v53 = vadd.f32 %v1170_v51, %v1169_v49 }
 0x13c   : > { %v1154_v54 = vadd.f32 %v1153_v52, %v1152_v50  ;;  %v1172_v55 = vrot.slane %v1171_v53, 2 }
 0x13e   : > { %v1155_v56 = vrot.slane %v1154_v54, 1  ;;  %v1173_v57 = vadd.f32 %v1172_v55, %v1171_v53 }
 0x140   : > { %v1156_v58 = vadd.f32 %v1155_v56, %v1154_v54  ;;  %v1174_v59 = vrot.slane %v1173_v57, 1 }
 0x142   : > { %1158 = vst.msk [vmem:[%s426_s13] sm:$0x1] %vm1157_vm4, %v1156_v58  ;;  %v1175_v60 = vadd.f32 %v1174_v59, %v1173_v57 }
 0x144   : > { %1176 = vst.msk [vmem:[%s433_s16] sm:$0x1] %vm1157_vm4, %v1175_v60 }
 0x145 PF: > { %s18_s28 = sadd.s32 1, %s1660_s28   ;;  %s1911_s24 = smov %s1652_s26 }
 0x146   : > { %p15_p10 = scmp.ge.s32.totalorder %s18_s28, 66   ;;  %s1912_s25 = smov %s1656_s27 }
 0x147   : > { %s1913_s26 = smov %s1916_s29  ;;  %s1914_s27 = smov %s1920_s30 }
 0x148   :  { %17 = sbr.rel (!%p15_p10) target bundleno = 3 (0x3), region = 108 }

// kernel: deconv_res_block.6
= control target key start
LH: loop header
LB: loop body
LE: loop exit
PB: predicated region body
PF: predicated region fallthrough
CT: control target
= control target key end

     0   :  { %s707_s18 = smov 0   ;;  %s709_s19 = smov 0   ;;  %s774_s0 = inlined_call_operand.vmem [shape: bf16[2,16,16,4], index: 0, kind: input, shape index: {}]   ;;  %s775_s1 = inlined_call_operand.vmem [shape: bf16[1,4,8], index: 1, kind: input, shape index: {}]   ;;  %s776_s2 = inlined_call_operand.vmem [shape: f32[1,8], index: 2, kind: input, shape index: {}]   ;;  %s777_s3 = inlined_call_operand.vmem [shape: f32[2,16,16,8], index: 3, kind: output, shape index: {0}]   ;;  %s778_s4 = inlined_call_operand.vmem [shape: f32[2,16,1,8], index: 4, kind: output, shape index: {1}]   ;;  %s779_s5 = inlined_call_operand.vmem [shape: f32[2,16,1,8], index: 5, kind: output, shape index: {2}]  }
   0x1   :  { %s711_s20 = smov 0   ;;  %s713_s21 = smov 0  }
   0x2   :  { %s715_s22 = smov 0  }
   0x3 LB: > { %s25_s23 = sadd.s32 1, %s665_s20  ;;  %s28_s24 = sadd.s32 1, %s669_s21  ;;  %s673_s22 = sphi %s715_s22, %s16_s22   ;;  %s669_s21 = sphi %s713_s21, %s783_s21   ;;  %s665_s20 = sphi %s711_s20, %s782_s20   ;;  %s661_s19 = sphi %s709_s19, %s781_s19   ;;  %s657_s18 = sphi %s707_s18, %s780_s18  }
   0x4   : > { %p26_p0 = scmp.ge.s32.totalorder %s25_s23, 16  ;;  %p570_p1 = scmp.ge.s32.totalorder %s673_s22, 1 }
   0x5   : > { %p216_p2 = scmp.lt.s32.totalorder %s673_s22, 33 }
   0x6   : > { %s785_s23 = smov (%p26_p0, %s25_s23), 0  ;;  %s787_s24 = smov (!%p26_p0, %s28_s24), %s669_s21 }
   0x7   : > { %p217_p3 = pnand %p570_p1, %p216_p2  ;;  %p30_p4 = scmp.ge.s32.totalorder %s787_s24, 2 }
   0x8   : > { %v301_v0 = vld [vmem:[%s775_s1] sm:$0x3] (!%p217_p3)  ;;  %vm318_vm0 = vcmask (!%p217_p3), 1041408   ;;  %p266_p5 = scmp.lt.s32.totalorder (!%p217_p3), %s661_s19, 1  ;;  %v675_v1 = vmov (!%p217_p3), 0.0   ;;  %vm676_vm1 = vmmov (!%p217_p3), 0  }
   0x9   : > { %s789_s24 = smov (%p30_p4, %s787_s24), 0  ;;  %220 = sbr.rel (%p217_p3) target bundleno = 257 (0x101), region = 32 }
   0xa   : > { %586 = vmatprep.subr.bf16.mxu0 (!%p217_p3), %v675_v1  ;;  %v320_v2 = vsel (!%p217_p3), %vm318_vm0, %v301_v0, 0  ;;  %588 = vmatprep.mubr.msk.bf16.mxu0 (!%p217_p3), %vm676_vm1, %v675_v1  ;;  %p268_p6 = scmp.lt.s32.totalorder (!%p217_p3), %s657_s18, 15  ;;  %vm314_vm2 = vcmask (!%p217_p3), 31744   ;;  %v579_v4 = vld [vmem:[%s776_s2] ss:$0 sm:$0xff] (!%p217_p3)  ;;  %vm363_vm3 = vcmask (!%p217_p3), 64512  }
   0xb   : > { %587 = vmatpush3.bf16.msra.mxu0 (!%p217_p3), %v320_v2  ;;  %vm375_vm4 = vcmask (!%p217_p3), 57344  }
  0x10   : > { %s791_s19 = smov (!%p266_p5, %s661_s19), 1  ;;  %s793_s18 = smov (!%p268_p6, %s657_s18), 15 }
  0x11   : > { %s572_s27 = sshll.u32 %s791_s19, 5  ;;  %s577_s28 = sshll.u32 %s791_s19, 4 }
  0x12   : > { %s571_s29 = sshll.u32 %s793_s18, 1  ;;  %s740_s30 = sadd.s32 %s577_s28, %s793_s18 }
  0x13   : > { %s272_s6 = sadd.s32 %s572_s27, %s571_s29  ;;  %s290_s19 = scalar_lea.vmem %s778_s4, %s740_s30 }
  0x14   : > { %s573_s7 = sshll.u32 %s272_s6, 2  ;;  %s576_s11 = sshll.u32 %s272_s6, 3 }
  0x15   : > { %s274_s10 = scalar_lea.vmem %s774_s0, %s573_s7  ;;  %s283_s16 = scalar_lea.vmem %s777_s3, %s576_s11 }
  0x16   : > { %v634_v3 = vld [vmem:[%s274_s10] sm:$0xff]   ;;  %s297_s27 = scalar_lea.vmem %s779_s5, %s740_s30 }
  0x17   : > { %589 = vmatmul.mubr.msk.bf16.vlgmr.msra.gmra.mrb[0].mxu0 %vm314_vm2, %v634_v3 }
  0xea   : > { %v356_v5 = vpop.f32.mrb[0].mxu0 }
  0xeb   : > { %v357_v6 = vadd.f32 %v579_v4, %v356_v5  ;;  %v590_v7 = vpop.f32.mrb[1].mxu0 }
  0xec   : > { %v359_v8 = vpop.f32.mrb[2].mxu0 }
  0xed   : > { %364 = vst.msk [vmem:[%s283_s16] sm:$0xff] %vm363_vm3, %v357_v6  ;;  %v377_v9 = vmul.f32 %v357_v6, %v357_v6  ;;  %v360_v10 = vadd.f32 %v579_v4, %v359_v8  ;;  %v591_v11 = vpop.f32.mrb[3].mxu0  ;;  %v366_v12 = vsel %vm363_vm3, %v357_v6, 0.0 }
  0xef   : > { %365 = vst.msk [vmem:[%s283_s16 + $0x8] sm:$0xff] %vm363_vm3, %v360_v10  ;;  %v367_v13 = vsel %vm363_vm3, %v360_v10, 0.0  ;;  %v378_v14 = vmul.f32 %v360_v10, %v360_v10  ;;  %v379_v16 = vsel %vm363_vm3, %v377_v9, 0.0 }
  0xf0   : > { %v368_v15 = vadd.f32 %v367_v13, %v366_v12 }
  0xf1   : > { %v380_v17 = vsel %vm363_vm3, %v378_v14, 0.0 }
  0xf2   : > { %v369_v18 = vrot.slane %v368_v15, 4  ;;  %v381_v19 = vadd.f32 %v380_v17, %v379_v16 }
  0xf4   : > { %v370_v20 = vadd.f32 %v369_v18, %v368_v15  ;;  %v382_v21 = vrot.slane %v381_v19, 4 }
  0xf6   : > { %v371_v22 = vrot.slane %v370_v20, 2  ;;  %v383_v23 = vadd.f32 %v382_v21, %v381_v19 }
  0xf8   : > { %v372_v24 = vadd.f32 %v371_v22, %v370_v20  ;;  %v384_v25 = vrot.slane %v383_v23, 2 }
  0xfa   : > { %v373_v26 = vrot.slane %v372_v24, 1  ;;  %v385_v27 = vadd.f32 %v384_v25, %v383_v23 }
  0xfc   : > { %v374_v28 = vadd.f32 %v373_v26, %v372_v24  ;;  %v386_v29 = vrot.slane %v385_v27, 1 }
  0xfe   : > { %376 = vst.msk [vmem:[%s290_s19] sm:$0x1] %vm375_vm4, %v374_v28  ;;  %v387_v30 = vadd.f32 %v386_v29, %v385_v27 }
 0x100   : > { %388 = vst.msk [vmem:[%s297_s27] sm:$0x1] %vm375_vm4, %v387_v30 }
 0x101 PF: > { %s16_s22 = sadd.s32 1, %s673_s22   ;;  %s780_s18 = smov %s665_s20 }
 0x102   : > { %p13_p7 = scmp.ge.s32.totalorder %s16_s22, 34   ;;  %s781_s19 = smov %s669_s21 }
 0x103   : > { %s782_s20 = smov %s785_s23  ;;  %s783_s21 = smov %s789_s24 }
 0x104   :  { %15 = sbr.rel (!%p13_p7) target bundleno = 3 (0x3), region = 86 }

// kernel: deconv_res_block.9
= control target key start
LH: loop header
LB: loop body
LE: loop exit
PB: predicated region body
PF: predicated region fallthrough
CT: control target
= control target key end

     0   :  { %s621_s0 = inlined_call_operand.vmem [shape: f32[128,128], index: 0, kind: input, shape index: {}]   ;;  %s622_s1 = inlined_call_operand.vmem [shape: f32[128,128], index: 1, kind: input, shape index: {}]   ;;  %s623_s2 = inlined_call_operand.vmem [shape: f32[1,128], index: 2, kind: input, shape index: {}]   ;;  %s624_s3 = inlined_call_operand.vmem [shape: f32[1,128], index: 3, kind: input, shape index: {}]   ;;  %s625_s4 = inlined_call_operand.vmem [shape: f32[1,128], index: 4, kind: input, shape index: {}]   ;;  %s626_s5 = inlined_call_operand.vmem [shape: f32[1,128], index: 5, kind: input, shape index: {}]   ;;  %s627_s6 = inlined_call_operand.vmem [shape: f32[1,128], index: 6, kind: input, shape index: {}]   ;;  %s628_s7 = inlined_call_operand.vmem [shape: f32[1,128], index: 7, kind: input, shape index: {}]   ;;  %s629_s8 = inlined_call_operand.vmem [shape: f32[128,128], index: 8, kind: output, shape index: {}]  }
   0x1   :  { %v29_v0 = vld [vmem:[%s621_s0] sm:$0xff]  ;;  %v30_v9 = vld [vmem:[%s621_s0 + $0x8] sm:$0xff]  ;;  %v31_v13 = vld [vmem:[%s621_s0 + $0x10] sm:$0xff] }
   0x2   :  { %v356_v1 = vld [vmem:[%s623_s2] ss:$0 sm:$0xff]  ;;  %v147_v12 = vld [vmem:[%s622_s1 + $0x8] sm:$0xff]  ;;  %v148_v14 = vld [vmem:[%s622_s1 + $0x10] sm:$0xff] }
   0x3   :  { %v361_v2 = vld [vmem:[%s624_s3] ss:$0 sm:$0xff]  ;;  %v52_v3 = vmul.f32 %v356_v1, %v29_v0  ;;  %v53_v11 = vmul.f32 %v356_v1, %v30_v9  ;;  %v54_v17 = vmul.f32 %v356_v1, %v31_v13  ;;  %v32_v19 = vld [vmem:[%s621_s0 + $0x18] sm:$0xff]  ;;  %v34_v50 = vld [vmem:[%s621_s0 + $0x28] sm:$0xff] }
   0x4   :  { %v146_v4 = vld [vmem:[%s622_s1] sm:$0xff]  ;;  %v149_v20 = vld [vmem:[%s622_s1 + $0x18] sm:$0xff]  ;;  %v55_v23 = vmul.f32 %v356_v1, %v32_v19  ;;  %v151_v51 = vld [vmem:[%s622_s1 + $0x28] sm:$0xff]  ;;  %v57_v63 = vmul.f32 %v356_v1, %v34_v50 }
   0x5   :  { %v370_v5 = vld [vmem:[%s626_s5] ss:$0 sm:$0xff]  ;;  %v75_v10 = vadd.f32 %v361_v2, %v52_v3  ;;  %v76_v22 = vadd.f32 %v361_v2, %v53_v11  ;;  %v77_v25 = vadd.f32 %v361_v2, %v54_v17  ;;  %v35_v54 = vld [vmem:[%s621_s0 + $0x30] sm:$0xff]  ;;  %v36_v59 = vld [vmem:[%s621_s0 + $0x38] sm:$0xff] }
   0x6   :  { %v375_v6 = vld [vmem:[%s625_s4] ss:$0 sm:$0xff]  ;;  %v169_v7 = vmul.f32 %v370_v5, %v146_v4  ;;  %v170_v16 = vmul.f32 %v370_v5, %v147_v12  ;;  %v171_v18 = vmul.f32 %v370_v5, %v148_v14  ;;  %v172_v27 = vmul.f32 %v370_v5, %v149_v20  ;;  %v152_v55 = vld [vmem:[%s622_s1 + $0x30] sm:$0xff]  ;;  %v153_v60 = vld [vmem:[%s622_s1 + $0x38] sm:$0xff] }
   0x7   :  { %v381_v8 = vld [vmem:[%s627_s6] ss:$0 sm:$0xff]  ;;  %vm91_vm0 = vcmp.ge.f32.partialorder %v75_v10, 0.0  ;;  %v114_v21 = vmul.f32 %v375_v6, %v75_v10  ;;  %vm92_vm1 = vcmp.ge.f32.partialorder %v76_v22, 0.0  ;;  %v115_v31 = vmul.f32 %v375_v6, %v76_v22  ;;  %v157_v50 = vld [vmem:[%s622_s1 + $0x58] sm:$0xff] }
   0x8   :  { %v192_v15 = vadd.f32 %v381_v8, %v169_v7  ;;  %v193_v24 = vadd.f32 %v381_v8, %v170_v16  ;;  %v194_v26 = vadd.f32 %v381_v8, %v171_v18  ;;  %v33_v28 = vld [vmem:[%s621_s0 + $0x20] sm:$0xff]  ;;  %v78_v32 = vadd.f32 %v361_v2, %v55_v23 }
   0x9   :  { %v130_v29 = vsel %vm91_vm0, %v75_v10, %v114_v21  ;;  %v420_v30 = vld [vmem:[%s628_s7] ss:$0 sm:$0xff]  ;;  %vm93_vm2 = vcmp.ge.f32.partialorder %v77_v25, 0.0  ;;  %v116_v34 = vmul.f32 %v375_v6, %v77_v25  ;;  %v195_v35 = vadd.f32 %v381_v8, %v172_v27 }
   0xa   :  { %v208_v33 = vadd.f32 %v192_v15, %v130_v29  ;;  %v150_v36 = vld [vmem:[%s622_s1 + $0x20] sm:$0xff]  ;;  %v131_v37 = vsel %vm92_vm1, %v76_v22, %v115_v31  ;;  %vm94_vm3 = vcmp.ge.f32.partialorder %v78_v32, 0.0  ;;  %v117_v38 = vmul.f32 %v375_v6, %v78_v32  ;;  %v38_v22 = vld [vmem:[%s621_s0 + $0x48] sm:$0xff] }
   0xb   :  { %v56_v39 = vmul.f32 %v356_v1, %v33_v28  ;;  %v209_v41 = vadd.f32 %v193_v24, %v131_v37  ;;  %v132_v42 = vsel %vm93_vm2, %v77_v25, %v116_v34  ;;  %v173_v46 = vmul.f32 %v370_v5, %v150_v36  ;;  %v37_v14 = vld [vmem:[%s621_s0 + $0x40] sm:$0xff] }
   0xc   :  { %vm224_vm4 = vcmp.ge.f32.partialorder %v208_v33, 0.0  ;;  %v247_v40 = vmul.f32 %v420_v30, %v208_v33  ;;  %v210_v43 = vadd.f32 %v194_v26, %v132_v42  ;;  %v133_v44 = vsel %vm94_vm3, %v78_v32, %v117_v38  ;;  %v154_v18 = vld [vmem:[%s622_s1 + $0x40] sm:$0xff]  ;;  %v155_v26 = vld [vmem:[%s622_s1 + $0x48] sm:$0xff] }
   0xd   :  { %v79_v45 = vadd.f32 %v361_v2, %v56_v39  ;;  %vm225_vm5 = vcmp.ge.f32.partialorder %v209_v41, 0.0  ;;  %v248_v48 = vmul.f32 %v420_v30, %v209_v41  ;;  %v211_v49 = vadd.f32 %v195_v35, %v133_v44  ;;  %v39_v44 = vld [vmem:[%s621_s0 + $0x50] sm:$0xff] }
   0xe   :  { %v263_v47 = vsel %vm224_vm4, %v208_v33, %v247_v40  ;;  %vm226_vm6 = vcmp.ge.f32.partialorder %v210_v43, 0.0  ;;  %v249_v52 = vmul.f32 %v420_v30, %v210_v43  ;;  %v196_v58 = vadd.f32 %v381_v8, %v173_v46 }
   0xf   :  { %279 = vst [vmem:[%s629_s8] sm:$0xff] %v263_v47  ;;  %vm95_vm7 = vcmp.ge.f32.partialorder %v79_v45, 0.0  ;;  %v118_v53 = vmul.f32 %v375_v6, %v79_v45  ;;  %v264_v56 = vsel %vm225_vm5, %v209_v41, %v248_v48  ;;  %vm227_vm8 = vcmp.ge.f32.partialorder %v211_v49, 0.0 }
  0x10   :  { %v250_v57 = vmul.f32 %v420_v30, %v211_v49  ;;  %280 = vst [vmem:[%s629_s8 + $0x8] sm:$0xff] %v264_v56  ;;  %v265_v61 = vsel %vm226_vm6, %v210_v43, %v249_v52  ;;  %v174_v0 = vmul.f32 %v370_v5, %v151_v51  ;;  %v58_v7 = vmul.f32 %v356_v1, %v35_v54  ;;  %v41_v51 = vld [vmem:[%s621_s0 + $0x60] sm:$0xff] }
  0x11   :  { %v134_v62 = vsel %vm95_vm7, %v79_v45, %v118_v53  ;;  %281 = vst [vmem:[%s629_s8 + $0x10] sm:$0xff] %v265_v61  ;;  %v175_v9 = vmul.f32 %v370_v5, %v152_v55  ;;  %v80_v10 = vadd.f32 %v361_v2, %v57_v63  ;;  %v59_v12 = vmul.f32 %v356_v1, %v36_v59  ;;  %v156_v45 = vld [vmem:[%s622_s1 + $0x50] sm:$0xff] }
  0x12   :  { %v266_v3 = vsel %vm227_vm8, %v211_v49, %v250_v57  ;;  %v212_v4 = vadd.f32 %v196_v58, %v134_v62  ;;  %v197_v11 = vadd.f32 %v381_v8, %v174_v0  ;;  %v176_v13 = vmul.f32 %v370_v5, %v153_v60  ;;  %v40_v49 = vld [vmem:[%s621_s0 + $0x58] sm:$0xff] }
  0x13   :  { %282 = vst [vmem:[%s629_s8 + $0x18] sm:$0xff] %v266_v3  ;;  %v81_v16 = vadd.f32 %v361_v2, %v58_v7  ;;  %v198_v17 = vadd.f32 %v381_v8, %v175_v9  ;;  %vm96_vm10 = vcmp.ge.f32.partialorder %v80_v10, 0.0  ;;  %v119_v19 = vmul.f32 %v375_v6, %v80_v10 }
  0x14   :  { %vm228_vm9 = vcmp.ge.f32.partialorder %v212_v4, 0.0  ;;  %v251_v15 = vmul.f32 %v420_v30, %v212_v4  ;;  %v82_v20 = vadd.f32 %v361_v2, %v59_v12  ;;  %v199_v21 = vadd.f32 %v381_v8, %v176_v13  ;;  %v42_v12 = vld [vmem:[%s621_s0 + $0x68] sm:$0xff] }
  0x15   :  { %vm97_vm11 = vcmp.ge.f32.partialorder %v81_v16, 0.0  ;;  %v120_v24 = vmul.f32 %v375_v6, %v81_v16  ;;  %v60_v25 = vmul.f32 %v356_v1, %v37_v14  ;;  %v135_v27 = vsel %vm96_vm10, %v80_v10, %v119_v19 }
  0x16   :  { %v267_v23 = vsel %vm228_vm9, %v212_v4, %v251_v15  ;;  %vm98_vm12 = vcmp.ge.f32.partialorder %v82_v20, 0.0  ;;  %v121_v28 = vmul.f32 %v375_v6, %v82_v20  ;;  %v177_v29 = vmul.f32 %v370_v5, %v154_v18  ;;  %v159_v15 = vld [vmem:[%s622_s1 + $0x68] sm:$0xff] }
  0x17   :  { %283 = vst [vmem:[%s629_s8 + $0x20] sm:$0xff] %v267_v23  ;;  %v213_v31 = vadd.f32 %v197_v11, %v135_v27  ;;  %v136_v32 = vsel %vm97_vm11, %v81_v16, %v120_v24  ;;  %v83_v33 = vadd.f32 %v361_v2, %v60_v25  ;;  %v61_v34 = vmul.f32 %v356_v1, %v38_v22  ;;  %v158_v11 = vld [vmem:[%s622_s1 + $0x60] sm:$0xff]  ;;  %v43_v16 = vld [vmem:[%s621_s0 + $0x70] sm:$0xff] }
  0x18   :  { %v214_v35 = vadd.f32 %v198_v17, %v136_v32  ;;  %v137_v36 = vsel %vm98_vm12, %v82_v20, %v121_v28  ;;  %v200_v37 = vadd.f32 %v381_v8, %v177_v29  ;;  %v178_v38 = vmul.f32 %v370_v5, %v155_v26  ;;  %v160_v23 = vld [vmem:[%s622_s1 + $0x70] sm:$0xff] }
  0x19   :  { %vm229_vm13 = vcmp.ge.f32.partialorder %v213_v31, 0.0  ;;  %v252_v39 = vmul.f32 %v420_v30, %v213_v31  ;;  %v215_v40 = vadd.f32 %v199_v21, %v137_v36  ;;  %vm99_vm14 = vcmp.ge.f32.partialorder %v83_v33, 0.0 }
  0x1a   :  { %vm230_vm15 = vcmp.ge.f32.partialorder %v214_v35, 0.0  ;;  %v253_v41 = vmul.f32 %v420_v30, %v214_v35  ;;  %v122_v42 = vmul.f32 %v375_v6, %v83_v33  ;;  %v84_v43 = vadd.f32 %v361_v2, %v61_v34 }
  0x1b   :  { %v268_v46 = vsel %vm229_vm13, %v213_v31, %v252_v39  ;;  %vm231_vm0 = vcmp.ge.f32.partialorder %v215_v40, 0.0  ;;  %v254_v47 = vmul.f32 %v420_v30, %v215_v40  ;;  %v201_v48 = vadd.f32 %v381_v8, %v178_v38  ;;  %v44_v39 = vld [vmem:[%s621_s0 + $0x78] sm:$0xff] }
  0x1c   :  { %284 = vst [vmem:[%s629_s8 + $0x28] sm:$0xff] %v268_v46  ;;  %v269_v52 = vsel %vm230_vm15, %v214_v35, %v253_v41  ;;  %v138_v53 = vsel %vm99_vm14, %v83_v33, %v122_v42  ;;  %vm100_vm1 = vcmp.ge.f32.partialorder %v84_v43, 0.0  ;;  %v123_v54 = vmul.f32 %v375_v6, %v84_v43  ;;  %v161_v42 = vld [vmem:[%s622_s1 + $0x78] sm:$0xff] }
  0x1d   :  { %285 = vst [vmem:[%s629_s8 + $0x30] sm:$0xff] %v269_v52  ;;  %v270_v55 = vsel %vm231_vm0, %v215_v40, %v254_v47  ;;  %v216_v56 = vadd.f32 %v200_v37, %v138_v53  ;;  %v62_v57 = vmul.f32 %v356_v1, %v39_v44  ;;  %v179_v58 = vmul.f32 %v370_v5, %v156_v45 }
  0x1e   :  { %286 = vst [vmem:[%s629_s8 + $0x38] sm:$0xff] %v270_v55  ;;  %v139_v59 = vsel %vm100_vm1, %v84_v43, %v123_v54  ;;  %v63_v60 = vmul.f32 %v356_v1, %v40_v49  ;;  %v180_v61 = vmul.f32 %v370_v5, %v157_v50  ;;  %v64_v62 = vmul.f32 %v356_v1, %v41_v51 }
  0x1f   :  { %vm232_vm2 = vcmp.ge.f32.partialorder %v216_v56, 0.0  ;;  %v255_v63 = vmul.f32 %v420_v30, %v216_v56  ;;  %v217_v0 = vadd.f32 %v201_v48, %v139_v59  ;;  %v85_v3 = vadd.f32 %v361_v2, %v62_v57 }
  0x20   :  { %v202_v4 = vadd.f32 %v381_v8, %v179_v58  ;;  %v86_v7 = vadd.f32 %v361_v2, %v63_v60  ;;  %v203_v9 = vadd.f32 %v381_v8, %v180_v61  ;;  %v87_v10 = vadd.f32 %v361_v2, %v64_v62 }
  0x21   :  { %v271_v13 = vsel %vm232_vm2, %v216_v56, %v255_v63  ;;  %vm233_vm3 = vcmp.ge.f32.partialorder %v217_v0, 0.0  ;;  %v256_v14 = vmul.f32 %v420_v30, %v217_v0  ;;  %vm101_vm4 = vcmp.ge.f32.partialorder %v85_v3, 0.0 }
  0x22   :  { %287 = vst [vmem:[%s629_s8 + $0x40] sm:$0xff] %v271_v13  ;;  %v124_v17 = vmul.f32 %v375_v6, %v85_v3  ;;  %vm102_vm5 = vcmp.ge.f32.partialorder %v86_v7, 0.0  ;;  %v125_v18 = vmul.f32 %v375_v6, %v86_v7  ;;  %vm103_vm6 = vcmp.ge.f32.partialorder %v87_v10, 0.0 }
  0x23   :  { %v272_v19 = vsel %vm233_vm3, %v217_v0, %v256_v14  ;;  %v126_v20 = vmul.f32 %v375_v6, %v87_v10  ;;  %v181_v21 = vmul.f32 %v370_v5, %v158_v11  ;;  %v65_v22 = vmul.f32 %v356_v1, %v42_v12 }
  0x24   :  { %288 = vst [vmem:[%s629_s8 + $0x48] sm:$0xff] %v272_v19  ;;  %v140_v24 = vsel %vm101_vm4, %v85_v3, %v124_v17  ;;  %v141_v25 = vsel %vm102_vm5, %v86_v7, %v125_v18  ;;  %v182_v26 = vmul.f32 %v370_v5, %v159_v15  ;;  %v66_v27 = vmul.f32 %v356_v1, %v43_v16 }
  0x25   :  { %v218_v28 = vadd.f32 %v202_v4, %v140_v24  ;;  %v219_v29 = vadd.f32 %v203_v9, %v141_v25  ;;  %v142_v31 = vsel %vm103_vm6, %v87_v10, %v126_v20  ;;  %v204_v32 = vadd.f32 %v381_v8, %v181_v21 }
  0x26   :  { %v88_v33 = vadd.f32 %v361_v2, %v65_v22  ;;  %v205_v34 = vadd.f32 %v381_v8, %v182_v26  ;;  %v89_v35 = vadd.f32 %v361_v2, %v66_v27  ;;  %v183_v36 = vmul.f32 %v370_v5, %v160_v23 }
  0x27   :  { %vm234_vm7 = vcmp.ge.f32.partialorder %v218_v28, 0.0  ;;  %v257_v37 = vmul.f32 %v420_v30, %v218_v28  ;;  %vm235_vm8 = vcmp.ge.f32.partialorder %v219_v29, 0.0  ;;  %v258_v38 = vmul.f32 %v420_v30, %v219_v29 }
  0x28   :  { %v220_v40 = vadd.f32 %v204_v32, %v142_v31  ;;  %vm104_vm9 = vcmp.ge.f32.partialorder %v88_v33, 0.0  ;;  %v127_v41 = vmul.f32 %v375_v6, %v88_v33  ;;  %vm105_vm10 = vcmp.ge.f32.partialorder %v89_v35, 0.0 }
  0x29   :  { %v273_v43 = vsel %vm234_vm7, %v218_v28, %v257_v37  ;;  %v274_v44 = vsel %vm235_vm8, %v219_v29, %v258_v38  ;;  %v128_v45 = vmul.f32 %v375_v6, %v89_v35  ;;  %v206_v46 = vadd.f32 %v381_v8, %v183_v36 }
  0x2a   :  { %289 = vst [vmem:[%s629_s8 + $0x50] sm:$0xff] %v273_v43  ;;  %290 = vst [vmem:[%s629_s8 + $0x58] sm:$0xff] %v274_v44  ;;  %vm236_vm11 = vcmp.ge.f32.partialorder %v220_v40, 0.0  ;;  %v259_v47 = vmul.f32 %v420_v30, %v220_v40  ;;  %v143_v48 = vsel %vm104_vm9, %v88_v33, %v127_v41  ;;  %v67_v49 = vmul.f32 %v356_v1, %v44_v39 }
  0x2b   :  { %v221_v50 = vadd.f32 %v205_v34, %v143_v48  ;;  %v144_v51 = vsel %vm105_vm10, %v89_v35, %v128_v45  ;;  %v184_v52 = vmul.f32 %v370_v5, %v161_v42 }
  0x2c   :  { %v275_v53 = vsel %vm236_vm11, %v220_v40, %v259_v47  ;;  %v222_v54 = vadd.f32 %v206_v46, %v144_v51  ;;  %v90_v55 = vadd.f32 %v361_v2, %v67_v49 }
  0x2d   :  { %291 = vst [vmem:[%s629_s8 + $0x60] sm:$0xff] %v275_v53  ;;  %vm237_vm12 = vcmp.ge.f32.partialorder %v221_v50, 0.0  ;;  %v260_v56 = vmul.f32 %v420_v30, %v221_v50  ;;  %v207_v57 = vadd.f32 %v381_v8, %v184_v52 }
  0x2e   :  { %vm238_vm13 = vcmp.ge.f32.partialorder %v222_v54, 0.0  ;;  %v261_v1 = vmul.f32 %v420_v30, %v222_v54  ;;  %vm106_vm14 = vcmp.ge.f32.partialorder %v90_v55, 0.0  ;;  %v129_v58 = vmul.f32 %v375_v6, %v90_v55 }
  0x2f   :  { %v276_v5 = vsel %vm237_vm12, %v221_v50, %v260_v56 }
  0x30   :  { %292 = vst [vmem:[%s629_s8 + $0x68] sm:$0xff] %v276_v5  ;;  %v277_v2 = vsel %vm238_vm13, %v222_v54, %v261_v1  ;;  %v145_v59 = vsel %vm106_vm14, %v90_v55, %v129_v58 }
  0x31   :  { %293 = vst [vmem:[%s629_s8 + $0x70] sm:$0xff] %v277_v2  ;;  %v223_v60 = vadd.f32 %v207_v57, %v145_v59 }
  0x33   :  { %vm239_vm15 = vcmp.ge.f32.partialorder %v223_v60, 0.0  ;;  %v262_v8 = vmul.f32 %v420_v30, %v223_v60 }
  0x35   :  { %v278_v61 = vsel %vm239_vm15, %v223_v60, %v262_v8 }
  0x36   :  { %294 = vst [vmem:[%s629_s8 + $0x78] sm:$0xff] %v278_v61 }

</bundles_post_ra>
